<compile_context>
chip_gen: v5e
topology: v5e:2x2
jax: 0.10.0
libtpu: 0.0.40
codegen_flags: <defaults>
</compile_context>

<pallas_src>
import functools

import jax
import jax.numpy as jnp
from jax.experimental import pallas as pl
from jax.experimental.pallas import tpu as pltpu


_MAX_BATCH_TILE = 512  # multiple of 256 (v6e/v7x MXU) and 128 (v5e MXU)


def _round_up(x, m):
    return (x + m - 1) // m * m


# ----------------------------------------------------------------------------
# Fused Pallas kernel: whole Generator forward for one batch tile.
# ----------------------------------------------------------------------------
def _generator_kernel(z_ref, w1_ref, b1_ref, w2q_ref, s2_ref, b2_ref,
                      w3_ref, b3_ref, w3h_ref, bh_ref, mixed_ref, heads_ref):
    # Mixer layer 1 (tiny (z_dim, h) weight kept f32).
    h1 = jnp.dot(z_ref[...], w1_ref[...], preferred_element_type=jnp.float32)
    h1 = jnp.maximum(h1 + b1_ref[...], 0.0)

    # Mixer layer 2: int8 weight, dequantized to bf16 for the MXU, per-output-
    # channel f32 scale applied to the f32 accumulator (VPU op).
    w2 = w2q_ref[...].astype(jnp.bfloat16)
    h2 = jnp.dot(h1.astype(jnp.bfloat16), w2,
                 preferred_element_type=jnp.float32) * s2_ref[...] + b2_ref[...]
    h2 = jnp.maximum(h2, 0.0)
    h2b = h2.astype(jnp.bfloat16)

    # Mixer layer 3 -> `mixed` (last dim pre-padded to a multiple of 128).
    mixed_ref[...] = (jnp.dot(h2b, w3_ref[...],
                              preferred_element_type=jnp.float32) + b3_ref[...])

    # All GenLayer heads at once via the pre-folded (h, head_pad) weight:
    # heads = h2 @ (w3.T @ blockdiag(Wg)) + (b3 @ blockdiag(Wg) + bg).
    heads_ref[...] = (jnp.dot(h2b, w3h_ref[...],
                              preferred_element_type=jnp.float32) + bh_ref[...])


# ----------------------------------------------------------------------------
# Parameter init (PyTorch-shaped f32) and packing (kernel layout).
# ----------------------------------------------------------------------------
def init_generator_params(key, z_dim, latent_dim, architecture, h=512):
    """Raw parameters with the same shapes/init style as the nn.Module."""
    n_layers = len(architecture) - 1
    mixer_dim = n_layers * latent_dim

    def linear_params(k, in_dim, out_dim):
        kw, kb = jax.random.split(k)
        scale = 1.0 / jnp.sqrt(jnp.float32(in_dim))
        w = jax.random.uniform(kw, (out_dim, in_dim), jnp.float32, -scale, scale)
        b = jax.random.uniform(kb, (out_dim,), jnp.float32, -scale, scale)
        return w, b

    keys = jax.random.split(key, 3 + n_layers)
    params = {
        "mixer": [
            linear_params(keys[0], z_dim, h),
            linear_params(keys[1], h, h),
            linear_params(keys[2], h, mixer_dim),
        ],
        "gen_layers": [],
    }
    for i in range(n_layers):
        layer_dim = architecture[i] * architecture[i + 1]
        bias_dim = architecture[i + 1]
        params["gen_layers"].append(
            linear_params(keys[3 + i], latent_dim, layer_dim + bias_dim)
        )
    return params


def pack_generator_params(raw, latent_dim, architecture):
    """One-time packing: pre-transpose, pad to lane multiples, int8-quantize the
    dominant (h, h) weight, and fold the block-diagonal head weight into the
    third mixer layer so all heads become one matmul from h2."""
    n_layers = len(architecture) - 1
    mixer_dim = n_layers * latent_dim
    mixer_pad = _round_up(mixer_dim, 128)

    (w1, b1), (w2, b2), (w3, b3) = raw["mixer"]

    # int8 per-output-channel quantization of the dominant (h, h) weight.
    w2t = w2.T                                                   # (h, h)
    amax = jnp.max(jnp.abs(w2t), axis=0, keepdims=True)          # (1, h)
    s2 = jnp.maximum(amax, 1e-12) / 127.0                        # (1, h) f32
    w2q = jnp.clip(jnp.round(w2t / s2), -127, 127).astype(jnp.int8)

    # Block-diagonal head weight (mixer_dim, head_pad) and its bias.
    head_dims = [architecture[i] * architecture[i + 1] + architecture[i + 1]
                 for i in range(n_layers)]
    total_head = sum(head_dims)
    head_pad = _round_up(total_head, 128)
    wh = jnp.zeros((mixer_dim, head_pad), jnp.float32)
    bh = jnp.zeros((1, head_pad), jnp.float32)
    off = 0
    for i in range(n_layers):
        gw, gb = raw["gen_layers"][i]                            # (out_i, latent)
        out_i = head_dims[i]
        wh = wh.at[i * latent_dim:(i + 1) * latent_dim, off:off + out_i].set(gw.T)
        bh = bh.at[0, off:off + out_i].set(gb)
        off += out_i

    # Fold mixer layer-3 into the heads (f32 fold, single bf16 quantization).
    w3t = w3.T                                                   # (h, mixer_dim)
    w3h = (w3t @ wh).astype(jnp.bfloat16)                        # (h, head_pad)
    bh_fold = b3.reshape(1, -1) @ wh + bh                        # (1, head_pad)

    return {
        "w1": w1.T,                                              # (z_dim, h) f32
        "b1": b1.reshape(1, -1),                                 # (1, h) f32
        "w2q": w2q,                                              # (h, h) int8
        "s2": s2,                                                # (1, h) f32
        "b2": b2.reshape(1, -1),                                 # (1, h) f32
        "w3": jnp.pad(w3t, ((0, 0), (0, mixer_pad - mixer_dim))
                      ).astype(jnp.bfloat16),                    # (h, mixer_pad)
        "b3": jnp.pad(b3.reshape(1, -1),
                      ((0, 0), (0, mixer_pad - mixer_dim))),     # (1, mixer_pad)
        "w3h": w3h,                                              # (h, head_pad)
        "bh": bh_fold,                                           # (1, head_pad)
    }


# ----------------------------------------------------------------------------
# Forward (equivalent of Generator.forward(z) with conditional=None).
# ----------------------------------------------------------------------------
@functools.partial(jax.jit, static_argnames=("architecture", "latent_dim"))
def generator_forward(packed, z, architecture, latent_dim):
    """Returns (weight_layers, biases, mixed), like the PyTorch module."""
    n_layers = len(architecture) - 1
    mixer_dim = n_layers * latent_dim
    head_dims = tuple(architecture[i] * architecture[i + 1] + architecture[i + 1]
                      for i in range(n_layers))
    total_head = sum(head_dims)

    B = z.shape[0]
    z_dim = z.shape[1]
    h = packed["w1"].shape[1]
    mixer_pad = packed["w3"].shape[1]
    head_pad = packed["w3h"].shape[1]

    # Batch tiling: single step for small B, streaming grid for large B.
    B8 = _round_up(max(B, 8), 8)
    TB = B8 if B8 <= _MAX_BATCH_TILE else _MAX_BATCH_TILE
    B_pad = _round_up(B8, TB)
    grid = (B_pad // TB,)
    z_p = jnp.pad(z, ((0, B_pad - B), (0, 0))) if B_pad != B else z

    weight_args = (packed["w1"], packed["b1"], packed["w2q"], packed["s2"],
                   packed["b2"], packed["w3"], packed["b3"], packed["w3h"],
                   packed["bh"])

    def const_spec(arr):  # full-array block, constant index -> DMA'd once
        return pl.BlockSpec(arr.shape, lambda i: (0, 0))

    flops = 2 * B_pad * (z_dim * h + h * h + h * mixer_pad + h * head_pad)
    bytes_accessed = (sum(int(a.size) * a.dtype.itemsize for a in weight_args)
                      + B_pad * z_dim * 4
                      + B_pad * (mixer_pad + head_pad) * 4)

    mixed_p, heads_p = pl.pallas_call(
        _generator_kernel,
        grid=grid,
        out_shape=(
            jax.ShapeDtypeStruct((B_pad, mixer_pad), jnp.float32),
            jax.ShapeDtypeStruct((B_pad, head_pad), jnp.float32),
        ),
        in_specs=[pl.BlockSpec((TB, z_dim), lambda i: (i, 0))]
                 + [const_spec(a) for a in weight_args],
        out_specs=(
            pl.BlockSpec((TB, mixer_pad), lambda i: (i, 0)),
            pl.BlockSpec((TB, head_pad), lambda i: (i, 0)),
        ),
        compiler_params=pltpu.CompilerParams(
            dimension_semantics=("parallel",)),
        cost_estimate=pl.CostEstimate(flops=flops, transcendentals=0,
                                      bytes_accessed=bytes_accessed),
    )(z_p, *weight_args)

    mixed = mixed_p[:B, :mixer_dim]
    heads = heads_p[:B, :total_head]

    weight_layers, biases = [], []
    off = 0
    for i in range(n_layers):
        layer_dim = architecture[i] * architecture[i + 1]
        bias_dim = architecture[i + 1]
        blk = heads[:, off:off + layer_dim + bias_dim]
        weight_layers.append(
            blk[:, :layer_dim].reshape(B, architecture[i + 1], architecture[i]))
        biases.append(blk[:, layer_dim:])
        off += layer_dim + bias_dim
    return weight_layers, biases, mixed


# ----------------------------------------------------------------------------
# Pure-JAX f32 reference (matches the PyTorch module's math exactly).
# ----------------------------------------------------------------------------
def _ref_forward(raw, z, architecture, latent_dim):
    (w1, b1), (w2, b2), (w3, b3) = raw["mixer"]
    h1 = jnp.maximum(z @ w1.T + b1, 0.0)
    h2 = jnp.maximum(h1 @ w2.T + b2, 0.0)
    mixed = h2 @ w3.T + b3
    n_layers = len(architecture) - 1
    B = z.shape[0]
    ws, bs = [], []
    for i in range(n_layers):
        head = mixed[:, i * latent_dim:(i + 1) * latent_dim]
        layer_dim = architecture[i] * architecture[i + 1]
        gw, gb = raw["gen_layers"][i]
        y = head @ gw.T + gb
        ws.append(y[:, :layer_dim].reshape(B, architecture[i + 1], architecture[i]))
        bs.append(y[:, layer_dim:])
    return ws, bs, mixed


def _check(outs, refs, atol=1e-2, rtol=1e-2):
    ws, bs, m = outs
    rw, rb, rm = refs
    assert jnp.allclose(m, rm, atol=atol, rtol=rtol)
    for a, b in zip(ws, rw):
        assert jnp.allclose(a, b, atol=atol, rtol=rtol)
    for a, b in zip(bs, rb):
        assert jnp.allclose(a, b, atol=atol, rtol=rtol)


# TODO(synk): conditional / mi_estimator / discriminator paths and train_step are
# training-loop logic outside the forward(z, conditional=None) spec; not ported.

if __name__ == "__main__":
    batch = 2
    z_dim = 8
    latent_dim = 16
    architecture = (4, 8, 4)   # -> n_layers = 2, mixer_dim = 32, head_out = 76
    h = 512                    # as in the module's __init__

    key = jax.random.PRNGKey(0)
    kp, kz, kz2 = jax.random.split(key, 3)
    raw_params = init_generator_params(kp, z_dim, latent_dim, architecture, h=h)
    packed = pack_generator_params(raw_params, latent_dim, architecture)

    # Small-batch path (grid=(1,)), matching the spec's shapes.
    z = jax.random.normal(kz, (batch, z_dim), jnp.float32)
    weight_layers, biases, mixed = generator_forward(
        packed, z, architecture, latent_dim)
    jax.block_until_ready((weight_layers, biases, mixed))

    assert mixed.shape == (batch, (len(architecture) - 1) * latent_dim)
    assert weight_layers[0].shape == (batch, architecture[1], architecture[0])
    assert weight_layers[1].shape == (batch, architecture[2], architecture[1])
    assert biases[0].shape == (batch, architecture[1])
    assert biases[1].shape == (batch, architecture[2])
    _check((weight_layers, biases, mixed),
           _ref_forward(raw_params, z, architecture, latent_dim))

    # Larger batch exercises the streaming grid path (weights VMEM-resident).
    z_big = jax.random.normal(kz2, (600, z_dim), jnp.float32)
    outs_big = generator_forward(packed, z_big, architecture, latent_dim)
    jax.block_until_ready(outs_big)
    _check(outs_big, _ref_forward(raw_params, z_big, architecture, latent_dim))

    print("KERNEL_OK")
</pallas_src>

<mosaic_0001>
module attributes {stable_mosaic.version = 11 : i64} {
  func.func @_generator_kernel(%arg0: i32, %arg1: memref<8x8xf32, #tpu.memory_space<vmem>>, %arg2: memref<8x512xf32, #tpu.memory_space<vmem>>, %arg3: memref<1x512xf32, #tpu.memory_space<vmem>>, %arg4: memref<512x512xi8, #tpu.memory_space<vmem>>, %arg5: memref<1x512xf32, #tpu.memory_space<vmem>>, %arg6: memref<1x512xf32, #tpu.memory_space<vmem>>, %arg7: memref<512x128xbf16, #tpu.memory_space<vmem>>, %arg8: memref<1x128xf32, #tpu.memory_space<vmem>>, %arg9: memref<512x128xbf16, #tpu.memory_space<vmem>>, %arg10: memref<1x128xf32, #tpu.memory_space<vmem>>, %arg11: memref<8x128xf32, #tpu.memory_space<vmem>>, %arg12: memref<8x128xf32, #tpu.memory_space<vmem>>) attributes {dimension_semantics = [#tpu.dimension_semantics<parallel>], iteration_bounds = array<i64: 1>, scalar_prefetch = 0 : i64, scratch_operands = 0 : i64, tpu.core_type = #tpu.core_type<tc>, window_params = [{transform_indices = @transform_0, window_bounds = array<i64: 8, 8>}, {pipeline_mode = #tpu.pipeline_mode<synchronous>, transform_indices = @transform_1, window_bounds = array<i64: 8, 512>}, {pipeline_mode = #tpu.pipeline_mode<synchronous>, transform_indices = @transform_2, window_bounds = array<i64: 1, 512>}, {pipeline_mode = #tpu.pipeline_mode<synchronous>, transform_indices = @transform_3, window_bounds = array<i64: 512, 512>}, {pipeline_mode = #tpu.pipeline_mode<synchronous>, transform_indices = @transform_4, window_bounds = array<i64: 1, 512>}, {pipeline_mode = #tpu.pipeline_mode<synchronous>, transform_indices = @transform_5, window_bounds = array<i64: 1, 512>}, {pipeline_mode = #tpu.pipeline_mode<synchronous>, transform_indices = @transform_6, window_bounds = array<i64: 512, 128>}, {pipeline_mode = #tpu.pipeline_mode<synchronous>, transform_indices = @transform_7, window_bounds = array<i64: 1, 128>}, {pipeline_mode = #tpu.pipeline_mode<synchronous>, transform_indices = @transform_8, window_bounds = array<i64: 512, 128>}, {pipeline_mode = #tpu.pipeline_mode<synchronous>, transform_indices = @transform_9, window_bounds = array<i64: 1, 128>}, {transform_indices = @transform_10, window_bounds = array<i64: 8, 128>}, {transform_indices = @transform_11, window_bounds = array<i64: 8, 128>}]} {
    %c0 = arith.constant 0 : index
    %c0_0 = arith.constant 0 : index
    %0 = vector.load %arg1[%c0, %c0_0] : memref<8x8xf32, #tpu.memory_space<vmem>>, vector<8x8xf32>
    %c0_1 = arith.constant 0 : index
    %c0_2 = arith.constant 0 : index
    %1 = vector.load %arg2[%c0_1, %c0_2] : memref<8x512xf32, #tpu.memory_space<vmem>>, vector<8x512xf32>
    %cst = arith.constant dense<0.000000e+00> : vector<8x512xf32>
    %2 = tpu.matmul %0, %1, %cst {dimension_numbers = #tpu.dot_dimension_numbers<[1], [0], [0], [1], [0, 0, 1, 1], [], []>} : vector<8x8xf32>, vector<8x512xf32>, vector<8x512xf32> -> vector<8x512xf32>
    %c0_3 = arith.constant 0 : index
    %c0_4 = arith.constant 0 : index
    %3 = vector.load %arg3[%c0_3, %c0_4] : memref<1x512xf32, #tpu.memory_space<vmem>>, vector<1x512xf32>
    %4 = vector.broadcast %3 : vector<1x512xf32> to vector<8x512xf32>
    %5 = arith.addf %2, %4 : vector<8x512xf32>
    %cst_5 = arith.constant 0.000000e+00 : f32
    %6 = vector.broadcast %cst_5 : f32 to vector<8x512xf32>
    %7 = arith.maximumf %5, %6 : vector<8x512xf32>
    %c0_6 = arith.constant 0 : index
    %c0_7 = arith.constant 0 : index
    %8 = vector.load %arg4[%c0_6, %c0_7] : memref<512x512xi8, #tpu.memory_space<vmem>>, vector<512x512xi8>
    %9 = arith.sitofp %8 : vector<512x512xi8> to vector<512x512xbf16>
    %10 = arith.truncf %7 : vector<8x512xf32> to vector<8x512xbf16>
    %cst_8 = arith.constant dense<0.000000e+00> : vector<8x512xf32>
    %11 = tpu.matmul %10, %9, %cst_8 {dimension_numbers = #tpu.dot_dimension_numbers<[1], [0], [0], [1], [0, 0, 1, 1], [], []>} : vector<8x512xbf16>, vector<512x512xbf16>, vector<8x512xf32> -> vector<8x512xf32>
    %c0_9 = arith.constant 0 : index
    %c0_10 = arith.constant 0 : index
    %12 = vector.load %arg5[%c0_9, %c0_10] : memref<1x512xf32, #tpu.memory_space<vmem>>, vector<1x512xf32>
    %13 = vector.broadcast %12 : vector<1x512xf32> to vector<8x512xf32>
    %14 = arith.mulf %11, %13 : vector<8x512xf32>
    %c0_11 = arith.constant 0 : index
    %c0_12 = arith.constant 0 : index
    %15 = vector.load %arg6[%c0_11, %c0_12] : memref<1x512xf32, #tpu.memory_space<vmem>>, vector<1x512xf32>
    %16 = vector.broadcast %15 : vector<1x512xf32> to vector<8x512xf32>
    %17 = arith.addf %14, %16 : vector<8x512xf32>
    %cst_13 = arith.constant 0.000000e+00 : f32
    %18 = vector.broadcast %cst_13 : f32 to vector<8x512xf32>
    %19 = arith.maximumf %17, %18 : vector<8x512xf32>
    %20 = arith.truncf %19 : vector<8x512xf32> to vector<8x512xbf16>
    %c0_14 = arith.constant 0 : index
    %c0_15 = arith.constant 0 : index
    %21 = vector.load %arg7[%c0_14, %c0_15] : memref<512x128xbf16, #tpu.memory_space<vmem>>, vector<512x128xbf16>
    %cst_16 = arith.constant dense<0.000000e+00> : vector<8x128xf32>
    %22 = tpu.matmul %20, %21, %cst_16 {dimension_numbers = #tpu.dot_dimension_numbers<[1], [0], [0], [1], [0, 0, 1, 1], [], []>} : vector<8x512xbf16>, vector<512x128xbf16>, vector<8x128xf32> -> vector<8x128xf32>
    %c0_17 = arith.constant 0 : index
    %c0_18 = arith.constant 0 : index
    %23 = vector.load %arg8[%c0_17, %c0_18] : memref<1x128xf32, #tpu.memory_space<vmem>>, vector<1x128xf32>
    %24 = vector.broadcast %23 : vector<1x128xf32> to vector<8x128xf32>
    %25 = arith.addf %22, %24 : vector<8x128xf32>
    %c0_19 = arith.constant 0 : index
    %c0_20 = arith.constant 0 : index
    %26 = vector.load %arg11[%c0_19, %c0_20] : memref<8x128xf32, #tpu.memory_space<vmem>>, vector<8x128xf32>
    tpu.vector_store %arg11[%c0_19, %c0_20], %25 {strides = array<i32>} : memref<8x128xf32, #tpu.memory_space<vmem>>, vector<8x128xf32>,
    %c0_21 = arith.constant 0 : index
    %c0_22 = arith.constant 0 : index
    %27 = vector.load %arg9[%c0_21, %c0_22] : memref<512x128xbf16, #tpu.memory_space<vmem>>, vector<512x128xbf16>
    %cst_23 = arith.constant dense<0.000000e+00> : vector<8x128xf32>
    %28 = tpu.matmul %20, %27, %cst_23 {dimension_numbers = #tpu.dot_dimension_numbers<[1], [0], [0], [1], [0, 0, 1, 1], [], []>} : vector<8x512xbf16>, vector<512x128xbf16>, vector<8x128xf32> -> vector<8x128xf32>
    %c0_24 = arith.constant 0 : index
    %c0_25 = arith.constant 0 : index
    %29 = vector.load %arg10[%c0_24, %c0_25] : memref<1x128xf32, #tpu.memory_space<vmem>>, vector<1x128xf32>
    %30 = vector.broadcast %29 : vector<1x128xf32> to vector<8x128xf32>
    %31 = arith.addf %28, %30 : vector<8x128xf32>
    %c0_26 = arith.constant 0 : index
    %c0_27 = arith.constant 0 : index
    %32 = vector.load %arg12[%c0_26, %c0_27] : memref<8x128xf32, #tpu.memory_space<vmem>>, vector<8x128xf32>
    tpu.vector_store %arg12[%c0_26, %c0_27], %31 {strides = array<i32>} : memref<8x128xf32, #tpu.memory_space<vmem>>, vector<8x128xf32>,
    return
  }
  func.func @transform_0(%arg0: i32) -> (i32, i32) {
    %c0_i32 = arith.constant 0 : i32
    %c0_i32_0 = arith.constant 0 : i32
    return %arg0, %c0_i32 : i32, i32
  }
  func.func @transform_1(%arg0: i32) -> (i32, i32) {
    %c0_i32 = arith.constant 0 : i32
    %c0_i32_0 = arith.constant 0 : i32
    %c0_i32_1 = arith.constant 0 : i32
    return %c0_i32, %c0_i32_0 : i32, i32
  }
  func.func @transform_2(%arg0: i32) -> (i32, i32) {
    %c0_i32 = arith.constant 0 : i32
    %c0_i32_0 = arith.constant 0 : i32
    %c0_i32_1 = arith.constant 0 : i32
    return %c0_i32, %c0_i32_0 : i32, i32
  }
  func.func @transform_3(%arg0: i32) -> (i32, i32) {
    %c0_i32 = arith.constant 0 : i32
    %c0_i32_0 = arith.constant 0 : i32
    %c0_i32_1 = arith.constant 0 : i32
    return %c0_i32, %c0_i32_0 : i32, i32
  }
  func.func @transform_4(%arg0: i32) -> (i32, i32) {
    %c0_i32 = arith.constant 0 : i32
    %c0_i32_0 = arith.constant 0 : i32
    %c0_i32_1 = arith.constant 0 : i32
    return %c0_i32, %c0_i32_0 : i32, i32
  }
  func.func @transform_5(%arg0: i32) -> (i32, i32) {
    %c0_i32 = arith.constant 0 : i32
    %c0_i32_0 = arith.constant 0 : i32
    %c0_i32_1 = arith.constant 0 : i32
    return %c0_i32, %c0_i32_0 : i32, i32
  }
  func.func @transform_6(%arg0: i32) -> (i32, i32) {
    %c0_i32 = arith.constant 0 : i32
    %c0_i32_0 = arith.constant 0 : i32
    %c0_i32_1 = arith.constant 0 : i32
    return %c0_i32, %c0_i32_0 : i32, i32
  }
  func.func @transform_7(%arg0: i32) -> (i32, i32) {
    %c0_i32 = arith.constant 0 : i32
    %c0_i32_0 = arith.constant 0 : i32
    %c0_i32_1 = arith.constant 0 : i32
    return %c0_i32, %c0_i32_0 : i32, i32
  }
  func.func @transform_8(%arg0: i32) -> (i32, i32) {
    %c0_i32 = arith.constant 0 : i32
    %c0_i32_0 = arith.constant 0 : i32
    %c0_i32_1 = arith.constant 0 : i32
    return %c0_i32, %c0_i32_0 : i32, i32
  }
  func.func @transform_9(%arg0: i32) -> (i32, i32) {
    %c0_i32 = arith.constant 0 : i32
    %c0_i32_0 = arith.constant 0 : i32
    %c0_i32_1 = arith.constant 0 : i32
    return %c0_i32, %c0_i32_0 : i32, i32
  }
  func.func @transform_10(%arg0: i32) -> (i32, i32) {
    %c0_i32 = arith.constant 0 : i32
    %c0_i32_0 = arith.constant 0 : i32
    return %arg0, %c0_i32 : i32, i32
  }
  func.func @transform_11(%arg0: i32) -> (i32, i32) {
    %c0_i32 = arith.constant 0 : i32
    %c0_i32_0 = arith.constant 0 : i32
    return %arg0, %c0_i32 : i32, i32
  }
}

</mosaic_0001>

<bundles_post_ra>
// kernel: generator_forward.1
= control target key start
LH: loop header
LB: loop body
LE: loop exit
PB: predicated region body
PF: predicated region fallthrough
CT: control target
= control target key end

     0   :  { %17 = vsyncpa [#allocation3], 0  ;;  %s2852_s0 = inlined_call_operand.vmem [shape: f32[8,8], index: 0, kind: input, shape index: {}]   ;;  %s2853_s1 = inlined_call_operand.hbm [shape: f32[8,512], index: 1, kind: input, shape index: {}]   ;;  %s2854_s2 = inlined_call_operand.vmem [shape: f32[1,512], index: 2, kind: input, shape index: {}]   ;;  %s2855_s3 = inlined_call_operand.hbm [shape: s8[512,512], index: 3, kind: input, shape index: {}]   ;;  %s2856_s4 = inlined_call_operand.vmem [shape: f32[1,512], index: 4, kind: input, shape index: {}]   ;;  %s2857_s5 = inlined_call_operand.hbm [shape: f32[1,512], index: 5, kind: input, shape index: {}]   ;;  %s2858_s6 = inlined_call_operand.hbm [shape: bf16[512,128], index: 6, kind: input, shape index: {}]   ;;  %s2859_s7 = inlined_call_operand.vmem [shape: f32[1,128], index: 7, kind: input, shape index: {}]   ;;  %s2860_s8 = inlined_call_operand.hbm [shape: bf16[512,128], index: 8, kind: input, shape index: {}]   ;;  %s2861_s9 = inlined_call_operand.vmem [shape: f32[1,128], index: 9, kind: input, shape index: {}]   ;;  %s2862_s10 = inlined_call_operand.vmem [shape: f32[8,128], index: 10, kind: output, shape index: {0}]   ;;  %s2863_s11 = inlined_call_operand.vmem [shape: f32[8,128], index: 11, kind: output, shape index: {1}]  }
   0x1   :  { %18 = vsyncpa [#allocation5], 0  ;;  %s39_s19 = sshll.u32 %s2855_s3, 4  ;;  %s40_s19 = int_to_ptr.hbm [resolvable:$true] %s39_s19 }
   0x2   :  { %19 = vsyncpa [#allocation8], 0  ;;  %s2264_s20 = smov [#allocation4]   ;;  %s65_s24 = sshll.u32 %s2858_s6, 4  ;;  %s66_s24 = int_to_ptr.hbm [resolvable:$true] %s65_s24 }
   0x3   :  { %s41_s21 = sshll.u32 %s2264_s20, 4  ;;  %s2265_s25 = smov 512   ;;  %s42_s21 = int_to_ptr.vmem [resolvable:$true] %s41_s21 }
   0x4   :  { %s2266_s26 = smov 32   ;;  %s2267_s27 = smov [#allocation7]  }
   0x5   :  { %47 = dma.hbm_to_vmem [thread:$0]  %s40_s19, 8192, %s42_s21, [#allocation5], %s2265_s25, %s2265_s25, %s2266_s26  }
   0x6   :  { %s67_s28 = sshll.u32 %s2267_s27, 4  ;;  %s2268_s29 = smov 64   ;;  %s68_s28 = int_to_ptr.vmem [resolvable:$true] %s67_s28 }
   0x7   :  { %s2269_s30 = smov 4   ;;  %s27_s13 = sshll.u32 %s2853_s1, 4  ;;  %s28_s13 = int_to_ptr.hbm [resolvable:$true] %s27_s13 }
   0x8   :  { %73 = dma.hbm_to_vmem [thread:$0]  %s66_s24, 4096, %s68_s28, [#allocation8], %s2268_s29, %s2268_s29, %s2269_s30  }
   0x9   :  { %s2270_s14 = smov [#allocation2]   ;;  %s55_s17 = sshll.u32 %s2857_s5, 4  ;;  %s56_s17 = int_to_ptr.hbm [resolvable:$true] %s55_s17 }
   0xa   :  { %s29_s15 = sshll.u32 %s2270_s14, 4  ;;  %s2271_s18 = smov [#allocation6]   ;;  %s30_s15 = int_to_ptr.vmem [resolvable:$true] %s29_s15 }
   0xb   :  { %32 = dma.hbm_to_vmem [thread:$0]  %s28_s13, 512, %s30_s15, [#allocation3]  }
   0xc   :  { %s57_s19 = sshll.u32 %s2271_s18, 4  ;;  %s80_s22 = sshll.u32 %s2860_s8, 4  ;;  %s58_s19 = int_to_ptr.vmem [resolvable:$true] %s57_s19  ;;  %s81_s22 = int_to_ptr.hbm [resolvable:$true] %s80_s22 }
   0xd   :  { %60 = dma.hbm_to_vmem [thread:$0]  %s56_s17, 64, %s58_s19, [#allocation5]  }
   0xe   :  { %s2272_s1 = smov [#allocation9]  }
   0xf   :  { %s82_s23 = sshll.u32 %s2272_s1, 4  ;;  %s83_s23 = int_to_ptr.vmem [resolvable:$true] %s82_s23 }
  0x10   :  { %88 = dma.hbm_to_vmem [thread:$0]  %s81_s22, 4096, %s83_s23, [#allocation8], %s2268_s29, %s2268_s29, %s2269_s30  }
  0x11   :  { %2258 = dma.done.wait [#allocation3], 512  }
  0x12   :  { %2259 = vsyncadd [#allocation3], 4294966784 }
  0x13   :  { %2260 = dma.done.wait [#allocation5], 8256  }
  0x14   :  { %2261 = vsyncadd [#allocation5], 4294959040 }
  0x15   :  { %2262 = dma.done.wait [#allocation8], 8192  }
  0x16   :  { %2263 = vsyncadd [#allocation8], 4294959104  ;;  %v112_v0 = vld [vmem:[#allocation2] sm:$0xff]  ;;  %v113_v1 = vld [vmem:[#allocation2 + $0x8] sm:$0xff]  ;;  %vm126_vm0 = vcmask 64512  }
  0x17   :  { %v114_v2 = vld [vmem:[#allocation2 + $0x10] sm:$0xff]  ;;  %145 = vmatpush.msra.mxu0 %v112_v0  ;;  %165 = vmatpush.msra.mxu1 %v113_v1  ;;  %v115_v3 = vld [vmem:[#allocation2 + $0x18] sm:$0xff]  ;;  %v111_v4 = vld [vmem:[%s2852_s0] sm:$0xff] }
  0x18   :  { %v226_v5 = vld [vmem:[#allocation4 + $0x60] sm:$0xff]  ;;  %185 = vmatpush.msra.mxu2 %v114_v2  ;;  %205 = vmatpush.msra.mxu3 %v115_v3 }
  0x19   :  { %v334_v6 = vunpack.c.2.s8 %v226_v5  ;;  %v338_v7 = vunpack.c.3.s8 %v226_v5  ;;  %v242_v8 = vld [vmem:[#allocation4 + $0xe0] sm:$0xff]  ;;  %v326_v9 = vunpack.c.0.s8 %v226_v5  ;;  %v330_v10 = vunpack.c.1.s8 %v226_v5  ;;  %1803 = vmatmul.msk.f32.vlgmr.msra.gmra.mxu0 %vm126_vm0, %v111_v4  ;;  %1804 = vmatmul.msk.f32.vlgmr.msra.gmra.mxu1 %vm126_vm0, %v111_v4 }
  0x1a   :  { %v398_v11 = vunpack.c.2.s8 %v242_v8  ;;  %v402_v12 = vunpack.c.3.s8 %v242_v8  ;;  %v390_v13 = vunpack.c.0.s8 %v242_v8  ;;  %v394_v14 = vunpack.c.1.s8 %v242_v8  ;;  %v258_v15 = vld [vmem:[#allocation4 + $0x160] sm:$0xff]  ;;  %1805 = vmatmul.msk.f32.vlgmr.msra.gmra.mxu2 %vm126_vm0, %v111_v4  ;;  %1806 = vmatmul.msk.f32.vlgmr.msra.gmra.mxu3 %vm126_vm0, %v111_v4 }
  0x1b   :  { %v590_v16 = vcvt.s32.f32 %v334_v6  ;;  %v594_v17 = vcvt.s32.f32 %v338_v7  ;;  %v582_v18 = vcvt.s32.f32 %v326_v9  ;;  %v586_v19 = vcvt.s32.f32 %v330_v10  ;;  %v274_v20 = vld [vmem:[#allocation4 + $0x1e0] sm:$0xff] }
  0x1c   :  { %v654_v21 = vcvt.s32.f32 %v398_v11  ;;  %v658_v22 = vcvt.s32.f32 %v402_v12  ;;  %v646_v23 = vcvt.s32.f32 %v390_v13  ;;  %v650_v24 = vcvt.s32.f32 %v394_v14  ;;  %v222_v25 = vld [vmem:[#allocation4 + $0x40] sm:$0xff] }
  0x1d   :  { %v818_v26 = vpack.c.bf16 %v594_v17, %v590_v16  ;;  %v814_v27 = vpack.c.bf16 %v586_v19, %v582_v18  ;;  %v462_v28 = vunpack.c.2.s8 %v258_v15  ;;  %v466_v29 = vunpack.c.3.s8 %v258_v15  ;;  %v238_v30 = vld [vmem:[#allocation4 + $0xc0] sm:$0xff] }
  0x1e   :  { %v850_v31 = vpack.c.bf16 %v658_v22, %v654_v21  ;;  %v846_v32 = vpack.c.bf16 %v650_v24, %v646_v23  ;;  %v526_v33 = vunpack.c.2.s8 %v274_v20  ;;  %v530_v34 = vunpack.c.3.s8 %v274_v20  ;;  %v254_v55 = vld [vmem:[#allocation4 + $0x140] sm:$0xff] }
  0x1f   :  { %922 = vmatpush.bf16.msrb.mxu0 %v818_v26  ;;  %v718_v35 = vcvt.s32.f32 %v462_v28  ;;  %v722_v36 = vcvt.s32.f32 %v466_v29  ;;  %v318_v37 = vunpack.c.2.s8 %v222_v25  ;;  %v322_v38 = vunpack.c.3.s8 %v222_v25  ;;  %v270_v0 = vld [vmem:[#allocation4 + $0x1c0] sm:$0xff] }
  0x20   :  { %935 = vmatpush.bf16.msrb.mxu1 %v850_v31  ;;  %v782_v39 = vcvt.s32.f32 %v526_v33  ;;  %v786_v40 = vcvt.s32.f32 %v530_v34  ;;  %v382_v41 = vunpack.c.2.s8 %v238_v30  ;;  %v386_v42 = vunpack.c.3.s8 %v238_v30  ;;  %v218_v5 = vld [vmem:[#allocation4 + $0x20] sm:$0xff] }
  0x21   :  { %v882_v43 = vpack.c.bf16 %v722_v36, %v718_v35  ;;  %v574_v44 = vcvt.s32.f32 %v318_v37  ;;  %v578_v45 = vcvt.s32.f32 %v322_v38  ;;  %v454_v46 = vunpack.c.0.s8 %v258_v15  ;;  %v234_v10 = vld [vmem:[#allocation4 + $0xa0] sm:$0xff] }
  0x22   :  { %v914_v47 = vpack.c.bf16 %v786_v40, %v782_v39  ;;  %v638_v48 = vcvt.s32.f32 %v382_v41  ;;  %v642_v49 = vcvt.s32.f32 %v386_v42  ;;  %v458_v50 = vunpack.c.1.s8 %v258_v15  ;;  %v250_v35 = vld [vmem:[#allocation4 + $0x120] sm:$0xff] }
  0x23   :  { %923 = vmatpush.bf16.msrb.mxu0 %v814_v27  ;;  %948 = vmatpush.bf16.msrb.mxu2 %v882_v43  ;;  %v810_v51 = vpack.c.bf16 %v578_v45, %v574_v44  ;;  %v710_v52 = vcvt.s32.f32 %v454_v46  ;;  %v518_v53 = vunpack.c.0.s8 %v274_v20  ;;  %v522_v54 = vunpack.c.1.s8 %v274_v20  ;;  %v266_v44 = vld [vmem:[#allocation4 + $0x1a0] sm:$0xff] }
  0x24   :  { %936 = vmatpush.bf16.msrb.mxu1 %v846_v32  ;;  %961 = vmatpush.bf16.msrb.mxu3 %v914_v47  ;;  %v842_v56 = vpack.c.bf16 %v642_v49, %v638_v48  ;;  %v714_v57 = vcvt.s32.f32 %v458_v50  ;;  %v310_v58 = vunpack.c.0.s8 %v222_v25  ;;  %v314_v59 = vunpack.c.1.s8 %v222_v25  ;;  %v214_v49 = vld [vmem:[#allocation4] sm:$0xff] }
  0x25   :  { %v774_v60 = vcvt.s32.f32 %v518_v53  ;;  %v778_v61 = vcvt.s32.f32 %v522_v54  ;;  %v374_v62 = vunpack.c.0.s8 %v238_v30  ;;  %v378_v63 = vunpack.c.1.s8 %v238_v30  ;;  %v230_v54 = vld [vmem:[#allocation4 + $0x80] sm:$0xff] }
  0x26   :  { %v878_v1 = vpack.c.bf16 %v714_v57, %v710_v52  ;;  %v566_v2 = vcvt.s32.f32 %v310_v58  ;;  %v570_v3 = vcvt.s32.f32 %v314_v59  ;;  %v446_v4 = vunpack.c.2.s8 %v254_v55 }
  0x27   :  { %924 = vmatpush.bf16.msrb.mxu0 %v810_v51  ;;  %v910_v6 = vpack.c.bf16 %v778_v61, %v774_v60  ;;  %v630_v7 = vcvt.s32.f32 %v374_v62  ;;  %v634_v8 = vcvt.s32.f32 %v378_v63  ;;  %v450_v9 = vunpack.c.3.s8 %v254_v55 }
  0x28   :  { %937 = vmatpush.bf16.msrb.mxu1 %v842_v56  ;;  %949 = vmatpush.bf16.msrb.mxu2 %v878_v1  ;;  %v806_v11 = vpack.c.bf16 %v570_v3, %v566_v2  ;;  %v702_v12 = vcvt.s32.f32 %v446_v4  ;;  %v510_v13 = vunpack.c.2.s8 %v270_v0  ;;  %v514_v14 = vunpack.c.3.s8 %v270_v0 }
  0x29   :  { %962 = vmatpush.bf16.msrb.mxu3 %v910_v6  ;;  %v838_v15 = vpack.c.bf16 %v634_v8, %v630_v7  ;;  %v706_v16 = vcvt.s32.f32 %v450_v9  ;;  %v302_v17 = vunpack.c.2.s8 %v218_v5  ;;  %v306_v18 = vunpack.c.3.s8 %v218_v5 }
  0x2a   :  { %v766_v19 = vcvt.s32.f32 %v510_v13  ;;  %v770_v20 = vcvt.s32.f32 %v514_v14  ;;  %v366_v21 = vunpack.c.2.s8 %v234_v10  ;;  %v370_v22 = vunpack.c.3.s8 %v234_v10 }
  0x2b   :  { %925 = vmatpush.bf16.msrb.mxu0 %v806_v11  ;;  %v874_v23 = vpack.c.bf16 %v706_v16, %v702_v12  ;;  %v558_v24 = vcvt.s32.f32 %v302_v17  ;;  %v562_v25 = vcvt.s32.f32 %v306_v18  ;;  %v438_v26 = vunpack.c.0.s8 %v254_v55 }
  0x2c   :  { %938 = vmatpush.bf16.msrb.mxu1 %v838_v15  ;;  %v906_v27 = vpack.c.bf16 %v770_v20, %v766_v19  ;;  %v622_v28 = vcvt.s32.f32 %v366_v21  ;;  %v626_v29 = vcvt.s32.f32 %v370_v22  ;;  %v442_v30 = vunpack.c.1.s8 %v254_v55  ;;  %v227_v15 = vld [vmem:[#allocation4 + $0x68] sm:$0xff] }
  0x2d   :  { %950 = vmatpush.bf16.msrb.mxu2 %v874_v23  ;;  %v802_v31 = vpack.c.bf16 %v562_v25, %v558_v24  ;;  %v694_v32 = vcvt.s32.f32 %v438_v26  ;;  %v502_v33 = vunpack.c.0.s8 %v270_v0  ;;  %v506_v34 = vunpack.c.1.s8 %v270_v0  ;;  %v243_v24 = vld [vmem:[#allocation4 + $0xe8] sm:$0xff] }
  0x2e   :  { %963 = vmatpush.bf16.msrb.mxu3 %v906_v27  ;;  %v834_v36 = vpack.c.bf16 %v626_v29, %v622_v28  ;;  %v698_v37 = vcvt.s32.f32 %v442_v30  ;;  %v294_v38 = vunpack.c.0.s8 %v218_v5  ;;  %v298_v39 = vunpack.c.1.s8 %v218_v5  ;;  %v246_v29 = vld [vmem:[#allocation4 + $0x100] sm:$0xff] }
  0x2f   :  { %926 = vmatpush.bf16.msrb.mxu0 %v802_v31  ;;  %v758_v40 = vcvt.s32.f32 %v502_v33  ;;  %v762_v41 = vcvt.s32.f32 %v506_v34  ;;  %v358_v42 = vunpack.c.0.s8 %v234_v10  ;;  %v362_v43 = vunpack.c.1.s8 %v234_v10  ;;  %v262_v34 = vld [vmem:[#allocation4 + $0x180] sm:$0xff] }
  0x30   :  { %939 = vmatpush.bf16.msrb.mxu1 %v834_v36  ;;  %v870_v45 = vpack.c.bf16 %v698_v37, %v694_v32  ;;  %v550_v46 = vcvt.s32.f32 %v294_v38  ;;  %v554_v47 = vcvt.s32.f32 %v298_v39  ;;  %v430_v48 = vunpack.c.2.s8 %v250_v35 }
  0x31   :  { %v902_v50 = vpack.c.bf16 %v762_v41, %v758_v40  ;;  %v614_v51 = vcvt.s32.f32 %v358_v42  ;;  %v618_v52 = vcvt.s32.f32 %v362_v43  ;;  %v434_v53 = vunpack.c.3.s8 %v250_v35 }
  0x32   :  { %951 = vmatpush.bf16.msrb.mxu2 %v870_v45  ;;  %v798_v55 = vpack.c.bf16 %v554_v47, %v550_v46  ;;  %v686_v56 = vcvt.s32.f32 %v430_v48  ;;  %v494_v57 = vunpack.c.2.s8 %v266_v44  ;;  %v498_v58 = vunpack.c.3.s8 %v266_v44 }
  0x33   :  { %964 = vmatpush.bf16.msrb.mxu3 %v902_v50  ;;  %v830_v59 = vpack.c.bf16 %v618_v52, %v614_v51  ;;  %v690_v60 = vcvt.s32.f32 %v434_v53  ;;  %v286_v61 = vunpack.c.2.s8 %v214_v49  ;;  %v290_v62 = vunpack.c.3.s8 %v214_v49 }
  0x34   :  { %927 = vmatpush.bf16.msrb.mxu0 %v798_v55  ;;  %v750_v63 = vcvt.s32.f32 %v494_v57  ;;  %v754_v0 = vcvt.s32.f32 %v498_v58  ;;  %v350_v1 = vunpack.c.2.s8 %v230_v54  ;;  %v354_v2 = vunpack.c.3.s8 %v230_v54 }
  0x35   :  { %940 = vmatpush.bf16.msrb.mxu1 %v830_v59  ;;  %v866_v3 = vpack.c.bf16 %v690_v60, %v686_v56  ;;  %v542_v4 = vcvt.s32.f32 %v286_v61  ;;  %v546_v5 = vcvt.s32.f32 %v290_v62  ;;  %v422_v6 = vunpack.c.0.s8 %v250_v35  ;;  %v259_v59 = vld [vmem:[#allocation4 + $0x168] sm:$0xff] }
  0x36   :  { %v898_v7 = vpack.c.bf16 %v754_v0, %v750_v63  ;;  %v606_v8 = vcvt.s32.f32 %v350_v1  ;;  %v610_v9 = vcvt.s32.f32 %v354_v2  ;;  %v426_v10 = vunpack.c.1.s8 %v250_v35 }
  0x37   :  { %952 = vmatpush.bf16.msrb.mxu2 %v866_v3  ;;  %v794_v11 = vpack.c.bf16 %v546_v5, %v542_v4  ;;  %v678_v12 = vcvt.s32.f32 %v422_v6  ;;  %v486_v13 = vunpack.c.0.s8 %v266_v44  ;;  %v490_v14 = vunpack.c.1.s8 %v266_v44  ;;  %v275_v4 = vld [vmem:[#allocation4 + $0x1e8] sm:$0xff] }
  0x38   :  { %965 = vmatpush.bf16.msrb.mxu3 %v898_v7  ;;  %v826_v16 = vpack.c.bf16 %v610_v9, %v606_v8  ;;  %v682_v17 = vcvt.s32.f32 %v426_v10  ;;  %v278_v18 = vunpack.c.0.s8 %v214_v49  ;;  %v282_v19 = vunpack.c.1.s8 %v214_v49  ;;  %v223_v9 = vld [vmem:[#allocation4 + $0x48] sm:$0xff] }
  0x39   :  { %928 = vmatpush.bf16.msrb.mxu0 %v794_v11  ;;  %v742_v20 = vcvt.s32.f32 %v486_v13  ;;  %v746_v21 = vcvt.s32.f32 %v490_v14  ;;  %v342_v22 = vunpack.c.0.s8 %v230_v54  ;;  %v346_v23 = vunpack.c.1.s8 %v230_v54  ;;  %v239_v14 = vld [vmem:[#allocation4 + $0xc8] sm:$0xff] }
  0x3a   :  { %941 = vmatpush.bf16.msrb.mxu1 %v826_v16  ;;  %v862_v25 = vpack.c.bf16 %v682_v17, %v678_v12  ;;  %v534_v26 = vcvt.s32.f32 %v278_v18  ;;  %v538_v27 = vcvt.s32.f32 %v282_v19  ;;  %v335_v28 = vunpack.c.2.s8 %v227_v15 }
  0x3b   :  { %v894_v30 = vpack.c.bf16 %v746_v21, %v742_v20  ;;  %v598_v31 = vcvt.s32.f32 %v342_v22  ;;  %v602_v32 = vcvt.s32.f32 %v346_v23  ;;  %v339_v33 = vunpack.c.3.s8 %v227_v15 }
  0x3c   :  { %953 = vmatpush.bf16.msrb.mxu2 %v862_v25  ;;  %v790_v35 = vpack.c.bf16 %v538_v27, %v534_v26  ;;  %v591_v36 = vcvt.s32.f32 %v335_v28  ;;  %v399_v37 = vunpack.c.2.s8 %v243_v24  ;;  %v403_v38 = vunpack.c.3.s8 %v243_v24 }
  0x3d   :  { %966 = vmatpush.bf16.msrb.mxu3 %v894_v30  ;;  %v822_v39 = vpack.c.bf16 %v602_v32, %v598_v31  ;;  %v595_v40 = vcvt.s32.f32 %v339_v33  ;;  %v414_v41 = vunpack.c.2.s8 %v246_v29  ;;  %v418_v42 = vunpack.c.3.s8 %v246_v29 }
  0x3e   :  { %929 = vmatpush.bf16.msrb.mxu0 %v790_v35  ;;  %v655_v43 = vcvt.s32.f32 %v399_v37  ;;  %v659_v44 = vcvt.s32.f32 %v403_v38  ;;  %v478_v45 = vunpack.c.2.s8 %v262_v34  ;;  %v482_v46 = vunpack.c.3.s8 %v262_v34 }
  0x3f   :  { %942 = vmatpush.bf16.msrb.mxu1 %v822_v39  ;;  %v819_v47 = vpack.c.bf16 %v595_v40, %v591_v36  ;;  %v670_v48 = vcvt.s32.f32 %v414_v41  ;;  %v674_v49 = vcvt.s32.f32 %v418_v42  ;;  %v327_v50 = vunpack.c.0.s8 %v227_v15  ;;  %v255_v39 = vld [vmem:[#allocation4 + $0x148] sm:$0xff] }
  0x40   :  { %v851_v51 = vpack.c.bf16 %v659_v44, %v655_v43  ;;  %v734_v52 = vcvt.s32.f32 %v478_v45  ;;  %v738_v53 = vcvt.s32.f32 %v482_v46  ;;  %v331_v54 = vunpack.c.1.s8 %v227_v15 }
  0x41   :  { %v858_v55 = vpack.c.bf16 %v674_v49, %v670_v48  ;;  %v583_v56 = vcvt.s32.f32 %v327_v50  ;;  %v391_v57 = vunpack.c.0.s8 %v243_v24  ;;  %v395_v58 = vunpack.c.1.s8 %v243_v24  ;;  %v271_v48 = vld [vmem:[#allocation4 + $0x1c8] sm:$0xff] }
  0x42   :  { %974 = vmatpush.bf16.msra.mxu0 %v819_v47  ;;  %v890_v60 = vpack.c.bf16 %v738_v53, %v734_v52  ;;  %v587_v61 = vcvt.s32.f32 %v331_v54  ;;  %v406_v62 = vunpack.c.0.s8 %v246_v29  ;;  %v410_v63 = vunpack.c.1.s8 %v246_v29  ;;  %v219_v53 = vld [vmem:[#allocation4 + $0x28] sm:$0xff] }
  0x43   :  { %987 = vmatpush.bf16.msra.mxu1 %v851_v51  ;;  %954 = vmatpush.bf16.msrb.mxu2 %v858_v55  ;;  %v647_v0 = vcvt.s32.f32 %v391_v57  ;;  %v651_v1 = vcvt.s32.f32 %v395_v58  ;;  %v470_v2 = vunpack.c.0.s8 %v262_v34  ;;  %v474_v3 = vunpack.c.1.s8 %v262_v34  ;;  %v235_v58 = vld [vmem:[#allocation4 + $0xa8] sm:$0xff] }
  0x44   :  { %967 = vmatpush.bf16.msrb.mxu3 %v890_v60  ;;  %v815_v5 = vpack.c.bf16 %v587_v61, %v583_v56  ;;  %v662_v6 = vcvt.s32.f32 %v406_v62  ;;  %v666_v7 = vcvt.s32.f32 %v410_v63  ;;  %v463_v8 = vunpack.c.2.s8 %v259_v59 }
  0x45   :  { %v847_v10 = vpack.c.bf16 %v651_v1, %v647_v0  ;;  %v726_v11 = vcvt.s32.f32 %v470_v2  ;;  %v730_v12 = vcvt.s32.f32 %v474_v3  ;;  %v467_v13 = vunpack.c.3.s8 %v259_v59 }
  0x46   :  { %975 = vmatpush.bf16.msra.mxu0 %v815_v5  ;;  %v854_v15 = vpack.c.bf16 %v666_v7, %v662_v6  ;;  %v719_v16 = vcvt.s32.f32 %v463_v8  ;;  %v527_v17 = vunpack.c.2.s8 %v275_v4  ;;  %v531_v18 = vunpack.c.3.s8 %v275_v4 }
  0x47   :  { %988 = vmatpush.bf16.msra.mxu1 %v847_v10  ;;  %v886_v19 = vpack.c.bf16 %v730_v12, %v726_v11  ;;  %v723_v20 = vcvt.s32.f32 %v467_v13  ;;  %v319_v21 = vunpack.c.2.s8 %v223_v9  ;;  %v323_v22 = vunpack.c.3.s8 %v223_v9 }
  0x48   :  { %955 = vmatpush.bf16.msrb.mxu2 %v854_v15  ;;  %v783_v23 = vcvt.s32.f32 %v527_v17  ;;  %v787_v24 = vcvt.s32.f32 %v531_v18  ;;  %v383_v25 = vunpack.c.2.s8 %v239_v14  ;;  %v387_v26 = vunpack.c.3.s8 %v239_v14 }
  0x49   :  { %968 = vmatpush.bf16.msrb.mxu3 %v886_v19  ;;  %v883_v27 = vpack.c.bf16 %v723_v20, %v719_v16  ;;  %v575_v28 = vcvt.s32.f32 %v319_v21  ;;  %v579_v29 = vcvt.s32.f32 %v323_v22  ;;  %v455_v30 = vunpack.c.0.s8 %v259_v59 }
  0x4a   :  { %v915_v31 = vpack.c.bf16 %v787_v24, %v783_v23  ;;  %v639_v32 = vcvt.s32.f32 %v383_v25  ;;  %v643_v33 = vcvt.s32.f32 %v387_v26  ;;  %v459_v34 = vunpack.c.1.s8 %v259_v59 }
  0x4b   :  { %v811_v35 = vpack.c.bf16 %v579_v29, %v575_v28  ;;  %v711_v36 = vcvt.s32.f32 %v455_v30  ;;  %v519_v37 = vunpack.c.0.s8 %v275_v4  ;;  %v523_v38 = vunpack.c.1.s8 %v275_v4 }
  0x4c   :  { %1000 = vmatpush.bf16.msra.mxu2 %v883_v27  ;;  %v843_v40 = vpack.c.bf16 %v643_v33, %v639_v32  ;;  %v715_v41 = vcvt.s32.f32 %v459_v34  ;;  %v311_v42 = vunpack.c.0.s8 %v223_v9  ;;  %v315_v43 = vunpack.c.1.s8 %v223_v9 }
  0x4d   :  { %1013 = vmatpush.bf16.msra.mxu3 %v915_v31  ;;  %976 = vmatpush.bf16.msra.mxu0 %v811_v35  ;;  %v775_v44 = vcvt.s32.f32 %v519_v37  ;;  %v779_v45 = vcvt.s32.f32 %v523_v38  ;;  %v375_v46 = vunpack.c.0.s8 %v239_v14  ;;  %v379_v47 = vunpack.c.1.s8 %v239_v14  ;;  %v251_v35 = vld [vmem:[#allocation4 + $0x128] sm:$0xff] }
  0x4e   :  { %989 = vmatpush.bf16.msra.mxu1 %v843_v40  ;;  %v879_v49 = vpack.c.bf16 %v715_v41, %v711_v36  ;;  %v567_v50 = vcvt.s32.f32 %v311_v42  ;;  %v571_v51 = vcvt.s32.f32 %v315_v43  ;;  %v447_v52 = vunpack.c.2.s8 %v255_v39  ;;  %v267_v36 = vld [vmem:[#allocation4 + $0x1a8] sm:$0xff] }
  0x4f   :  { %v911_v54 = vpack.c.bf16 %v779_v45, %v775_v44  ;;  %v631_v55 = vcvt.s32.f32 %v375_v46  ;;  %v635_v56 = vcvt.s32.f32 %v379_v47  ;;  %v451_v57 = vunpack.c.3.s8 %v255_v39  ;;  %v215_v41 = vld [vmem:[#allocation4 + $0x8] sm:$0xff] }
  0x50   :  { %1001 = vmatpush.bf16.msra.mxu2 %v879_v49  ;;  %v807_v59 = vpack.c.bf16 %v571_v51, %v567_v50  ;;  %v703_v60 = vcvt.s32.f32 %v447_v52  ;;  %v511_v61 = vunpack.c.2.s8 %v271_v48  ;;  %v515_v62 = vunpack.c.3.s8 %v271_v48  ;;  %v231_v42 = vld [vmem:[#allocation4 + $0x88] sm:$0xff] }
  0x51   :  { %1014 = vmatpush.bf16.msra.mxu3 %v911_v54  ;;  %v839_v63 = vpack.c.bf16 %v635_v56, %v631_v55  ;;  %v707_v0 = vcvt.s32.f32 %v451_v57  ;;  %v303_v1 = vunpack.c.2.s8 %v219_v53  ;;  %v307_v2 = vunpack.c.3.s8 %v219_v53 }
  0x52   :  { %977 = vmatpush.bf16.msra.mxu0 %v807_v59  ;;  %v767_v3 = vcvt.s32.f32 %v511_v61  ;;  %v771_v4 = vcvt.s32.f32 %v515_v62  ;;  %v367_v5 = vunpack.c.2.s8 %v235_v58  ;;  %v371_v6 = vunpack.c.3.s8 %v235_v58 }
  0x53   :  { %990 = vmatpush.bf16.msra.mxu1 %v839_v63  ;;  %v875_v7 = vpack.c.bf16 %v707_v0, %v703_v60  ;;  %v559_v8 = vcvt.s32.f32 %v303_v1  ;;  %v563_v9 = vcvt.s32.f32 %v307_v2  ;;  %v439_v10 = vunpack.c.0.s8 %v255_v39  ;;  %v228_v2 = vld [vmem:[#allocation4 + $0x70] sm:$0xff] }
  0x54   :  { %v907_v11 = vpack.c.bf16 %v771_v4, %v767_v3  ;;  %v623_v12 = vcvt.s32.f32 %v367_v5  ;;  %v627_v13 = vcvt.s32.f32 %v371_v6  ;;  %v443_v14 = vunpack.c.1.s8 %v255_v39  ;;  %v2358_v3 = vld [vmem:[%s2854_s2] sm:$0xf] }
  0x55   :  { %1002 = vmatpush.bf16.msra.mxu2 %v875_v7  ;;  %v803_v15 = vpack.c.bf16 %v563_v9, %v559_v8  ;;  %v695_v16 = vcvt.s32.f32 %v439_v10  ;;  %v503_v17 = vunpack.c.0.s8 %v271_v48  ;;  %v507_v18 = vunpack.c.1.s8 %v271_v48 }
  0x56   :  { %1015 = vmatpush.bf16.msra.mxu3 %v907_v11  ;;  %v835_v19 = vpack.c.bf16 %v627_v13, %v623_v12  ;;  %v699_v20 = vcvt.s32.f32 %v443_v14  ;;  %v295_v21 = vunpack.c.0.s8 %v219_v53  ;;  %v299_v22 = vunpack.c.1.s8 %v219_v53  ;;  %v244_v12 = vld [vmem:[#allocation4 + $0xf0] sm:$0xff] }
  0x57   :  { %978 = vmatpush.bf16.msra.mxu0 %v803_v15  ;;  %v759_v23 = vcvt.s32.f32 %v503_v17  ;;  %v763_v24 = vcvt.s32.f32 %v507_v18  ;;  %v359_v25 = vunpack.c.0.s8 %v235_v58  ;;  %v363_v26 = vunpack.c.1.s8 %v235_v58  ;;  %v263_v17 = vld [vmem:[#allocation4 + $0x188] sm:$0xff] }
  0x58   :  { %991 = vmatpush.bf16.msra.mxu1 %v835_v19  ;;  %v871_v27 = vpack.c.bf16 %v699_v20, %v695_v16  ;;  %v551_v28 = vcvt.s32.f32 %v295_v21  ;;  %v555_v29 = vcvt.s32.f32 %v299_v22  ;;  %v431_v37 = vunpack.c.2.s8 %v251_v35  ;;  %v247_v16 = vld [vmem:[#allocation4 + $0x108] sm:$0xff] }
  0x59   :  { %v903_v30 = vpack.c.bf16 %v763_v24, %v759_v23  ;;  %v615_v31 = vcvt.s32.f32 %v359_v25  ;;  %v619_v32 = vcvt.s32.f32 %v363_v26  ;;  %v435_v38 = vunpack.c.3.s8 %v251_v35 }
  0x5a   :  { %1003 = vmatpush.bf16.msra.mxu2 %v871_v27  ;;  %v799_v33 = vpack.c.bf16 %v555_v29, %v551_v28  ;;  %v495_v39 = vunpack.c.2.s8 %v267_v36  ;;  %v499_v40 = vunpack.c.3.s8 %v267_v36  ;;  %v687_v43 = vcvt.s32.f32 %v431_v37 }
  0x5b   :  { %1016 = vmatpush.bf16.msra.mxu3 %v903_v30  ;;  %v831_v34 = vpack.c.bf16 %v619_v32, %v615_v31  ;;  %v691_v44 = vcvt.s32.f32 %v435_v38  ;;  %v287_v47 = vunpack.c.2.s8 %v215_v41  ;;  %v291_v48 = vunpack.c.3.s8 %v215_v41 }
  0x5c   :  { %979 = vmatpush.bf16.msra.mxu0 %v799_v33  ;;  %v751_v45 = vcvt.s32.f32 %v495_v39  ;;  %v755_v46 = vcvt.s32.f32 %v499_v40  ;;  %v351_v49 = vunpack.c.2.s8 %v231_v42  ;;  %v355_v50 = vunpack.c.3.s8 %v231_v42 }
  0x5d   :  { %992 = vmatpush.bf16.msra.mxu1 %v831_v34  ;;  %v867_v51 = vpack.c.bf16 %v691_v44, %v687_v43  ;;  %v423_v53 = vunpack.c.0.s8 %v251_v35  ;;  %v427_v54 = vunpack.c.1.s8 %v251_v35  ;;  %v543_v55 = vcvt.s32.f32 %v287_v47 }
  0x5e   :  { %v899_v52 = vpack.c.bf16 %v755_v46, %v751_v45  ;;  %v547_v56 = vcvt.s32.f32 %v291_v48  ;;  %v607_v57 = vcvt.s32.f32 %v351_v49  ;;  %v611_v58 = vcvt.s32.f32 %v355_v50  ;;  %v260_v46 = vld [vmem:[#allocation4 + $0x170] sm:$0xff] }
  0x5f   :  { %1004 = vmatpush.bf16.msra.mxu2 %v867_v51  ;;  %v679_v59 = vcvt.s32.f32 %v423_v53  ;;  %v683_v60 = vcvt.s32.f32 %v427_v54  ;;  %v487_v61 = vunpack.c.0.s8 %v267_v36  ;;  %v491_v63 = vunpack.c.1.s8 %v267_v36  ;;  %v276_v51 = vld [vmem:[#allocation4 + $0x1f0] sm:$0xff] }
  0x60   :  { %1017 = vmatpush.bf16.msra.mxu3 %v899_v52  ;;  %v795_v62 = vpack.c.bf16 %v547_v56, %v543_v55  ;;  %v279_v0 = vunpack.c.0.s8 %v215_v41  ;;  %v283_v1 = vunpack.c.1.s8 %v215_v41  ;;  %v827_v4 = vpack.c.bf16 %v611_v58, %v607_v57 }
  0x61   :  { %v863_v5 = vpack.c.bf16 %v683_v60, %v679_v59  ;;  %v743_v6 = vcvt.s32.f32 %v487_v61  ;;  %v343_v7 = vunpack.c.0.s8 %v231_v42  ;;  %v747_v8 = vcvt.s32.f32 %v491_v63  ;;  %v224_v60 = vld [vmem:[#allocation4 + $0x50] sm:$0xff] }
  0x62   :  { %980 = vmatpush.bf16.msra.mxu0 %v795_v62  ;;  %v535_v9 = vcvt.s32.f32 %v279_v0  ;;  %v539_v10 = vcvt.s32.f32 %v283_v1  ;;  %v347_v11 = vunpack.c.1.s8 %v231_v42  ;;  %993 = vmatpush.bf16.msra.mxu1 %v827_v4  ;;  %v336_v14 = vunpack.c.2.s8 %v228_v2  ;;  %v240_v1 = vld [vmem:[#allocation4 + $0xd0] sm:$0xff] }
  0x63   :  { %1005 = vmatpush.bf16.msra.mxu2 %v863_v5  ;;  %v599_v13 = vcvt.s32.f32 %v343_v7  ;;  %v340_v15 = vunpack.c.3.s8 %v228_v2  ;;  %v118_v18 = vperm.slane %v2358_v3, 0  ;;  %v895_v19 = vpack.c.bf16 %v747_v8, %v743_v6 }
  0x64   :  { %v791_v20 = vpack.c.bf16 %v539_v10, %v535_v9  ;;  %v603_v21 = vcvt.s32.f32 %v347_v11  ;;  %v119_v22 = vperm.slane %v2358_v3, 1  ;;  %v120_v23 = vperm.slane %v2358_v3, 2 }
  0x65   :  { %v400_v24 = vunpack.c.2.s8 %v244_v12  ;;  %v404_v25 = vunpack.c.3.s8 %v244_v12  ;;  %1018 = vmatpush.bf16.msra.mxu3 %v895_v19  ;;  %v415_v27 = vunpack.c.2.s8 %v247_v16  ;;  %v419_v28 = vunpack.c.3.s8 %v247_v16 }
  0x66   :  { %981 = vmatpush.bf16.msra.mxu0 %v791_v20  ;;  %v823_v26 = vpack.c.bf16 %v603_v21, %v599_v13  ;;  %v479_v29 = vunpack.c.2.s8 %v263_v17  ;;  %v121_v30 = vperm.slane %v2358_v3, 3  ;;  %v2364_v31 = vcvt.s32.f32 %v336_v14 }
  0x67   :  { %v2366_v32 = vcvt.s32.f32 %v340_v15  ;;  %v483_v33 = vunpack.c.3.s8 %v263_v17  ;;  %v671_v34 = vcvt.s32.f32 %v415_v27  ;;  %v675_v35 = vcvt.s32.f32 %v419_v28 }
  0x68   :  { %994 = vmatpush.bf16.msra.mxu1 %v823_v26  ;;  %v735_v36 = vcvt.s32.f32 %v479_v29  ;;  %v328_v37 = vunpack.c.0.s8 %v228_v2  ;;  %v2368_v38 = vcvt.s32.f32 %v400_v24  ;;  %v2370_v39 = vcvt.s32.f32 %v404_v25 }
  0x69   :  { %v739_v40 = vcvt.s32.f32 %v483_v33  ;;  %v332_v41 = vunpack.c.1.s8 %v228_v2  ;;  %v859_v42 = vpack.c.bf16 %v675_v35, %v671_v34  ;;  %v392_v44 = vunpack.c.0.s8 %v244_v12  ;;  %v256_v33 = vld [vmem:[#allocation4 + $0x150] sm:$0xff] }
  0x6a   :  { %v2372_v43 = vcvt.s32.f32 %v328_v37  ;;  %v407_v45 = vunpack.c.0.s8 %v247_v16  ;;  %v396_v49 = vunpack.c.1.s8 %v244_v12  ;;  %v411_v50 = vunpack.c.1.s8 %v247_v16 }
  0x6b   :  { %v891_v47 = vpack.c.bf16 %v739_v40, %v735_v36  ;;  %v2374_v48 = vcvt.s32.f32 %v332_v41  ;;  %v820_v52 = vpack.c.bf16 %v2366_v32, %v2364_v31  ;;  %1006 = vmatpush.bf16.msra.mxu2 %v859_v42  ;;  %v471_v54 = vunpack.c.0.s8 %v263_v17  ;;  %v272_v40 = vld [vmem:[#allocation4 + $0x1d0] sm:$0xff] }
  0x6c   :  { %v663_v53 = vcvt.s32.f32 %v407_v45  ;;  %v475_v55 = vunpack.c.1.s8 %v263_v17  ;;  %v852_v56 = vpack.c.bf16 %v2370_v39, %v2368_v38  ;;  %v667_v57 = vcvt.s32.f32 %v411_v50 }
  0x6d   :  { %1019 = vmatpush.bf16.msra.mxu3 %v891_v47  ;;  %v464_v58 = vunpack.c.2.s8 %v260_v46  ;;  %v468_v59 = vunpack.c.3.s8 %v260_v46  ;;  %v2380_v61 = vcvt.s32.f32 %v392_v44  ;;  %v727_v62 = vcvt.s32.f32 %v471_v54  ;;  %v2479_v47 = vld [vmem:[#allocation4 + $0x10] sm:$0xff] }
  0x6e   :  { %v731_v63 = vcvt.s32.f32 %v475_v55  ;;  %v528_v0 = vunpack.c.2.s8 %v276_v51  ;;  %v2384_v4 = vcvt.s32.f32 %v396_v49  ;;  %v855_v5 = vpack.c.bf16 %v667_v57, %v663_v53 }
  0x6f   :  { %v532_v6 = vunpack.c.3.s8 %v276_v51  ;;  %v2386_v8 = vcvt.s32.f32 %v464_v58  ;;  %v320_v9 = vunpack.c.2.s8 %v224_v60  ;;  %v324_v10 = vunpack.c.3.s8 %v224_v60  ;;  %v236_v58 = vld [vmem:[#allocation4 + $0xb0] sm:$0xff] }
  0x70   :  { %v887_v7 = vpack.c.bf16 %v731_v63, %v727_v62  ;;  %1007 = vmatpush.bf16.msra.mxu2 %v855_v5  ;;  %v2388_v11 = vcvt.s32.f32 %v468_v59  ;;  %v2390_v12 = vcvt.s32.f32 %v528_v0  ;;  %v384_v13 = vunpack.c.2.s8 %v240_v1 }
  0x71   :  { %v388_v14 = vunpack.c.3.s8 %v240_v1  ;;  %v2392_v15 = vcvt.s32.f32 %v532_v6  ;;  %v2394_v16 = vcvt.s32.f32 %v320_v9  ;;  %v456_v17 = vunpack.c.0.s8 %v260_v46 }
  0x72   :  { %1020 = vmatpush.bf16.msra.mxu3 %v887_v7  ;;  %v460_v19 = vunpack.c.1.s8 %v260_v46  ;;  %v2396_v20 = vcvt.s32.f32 %v324_v10  ;;  %v2398_v21 = vcvt.s32.f32 %v384_v13  ;;  %v520_v25 = vunpack.c.0.s8 %v276_v51 }
  0x73   :  { %v2400_v24 = vcvt.s32.f32 %v388_v14  ;;  %v2404_v27 = vcvt.s32.f32 %v456_v17  ;;  %v524_v29 = vunpack.c.1.s8 %v276_v51  ;;  %v312_v36 = vunpack.c.0.s8 %v224_v60  ;;  %v220_v51 = vld [vmem:[#allocation4 + $0x30] sm:$0xff] }
  0x74   :  { %v2406_v28 = vcvt.s32.f32 %v460_v19  ;;  %v2410_v35 = vcvt.s32.f32 %v520_v25  ;;  %v316_v37 = vunpack.c.1.s8 %v224_v60  ;;  %v376_v44 = vunpack.c.0.s8 %v240_v1 }
  0x75   :  { %v2414_v42 = vcvt.s32.f32 %v524_v29  ;;  %v380_v45 = vunpack.c.1.s8 %v240_v1  ;;  %v448_v49 = vunpack.c.2.s8 %v256_v33  ;;  %v452_v50 = vunpack.c.3.s8 %v256_v33 }
  0x76   :  { %v2422_v54 = vcvt.s32.f32 %v312_v36  ;;  %v2424_v55 = vcvt.s32.f32 %v316_v37  ;;  %v512_v57 = vunpack.c.2.s8 %v272_v40  ;;  %v2428_v60 = vcvt.s32.f32 %v376_v44  ;;  %v2464_v36 = vld [vmem:[#allocation4 + $0x130] sm:$0xff] }
  0x77   :  { %v2430_v62 = vcvt.s32.f32 %v380_v45  ;;  %v516_v63 = vunpack.c.3.s8 %v272_v40  ;;  %v2432_v0 = vcvt.s32.f32 %v448_v49  ;;  %v2434_v1 = vcvt.s32.f32 %v452_v50 }
  0x78   :  { %v304_v5 = vunpack.c.2.s8 %v220_v51  ;;  %v308_v6 = vunpack.c.3.s8 %v220_v51  ;;  %v2436_v7 = vcvt.s32.f32 %v512_v57  ;;  %v368_v10 = vunpack.c.2.s8 %v236_v58 }
  0x79   :  { %v2438_v9 = vcvt.s32.f32 %v516_v63  ;;  %v372_v13 = vunpack.c.3.s8 %v236_v58  ;;  %v440_v19 = vunpack.c.0.s8 %v256_v33  ;;  %v444_v25 = vunpack.c.1.s8 %v256_v33 }
  0x7a   :  { %v2440_v14 = vcvt.s32.f32 %v304_v5  ;;  %v2442_v17 = vcvt.s32.f32 %v308_v6  ;;  %v2448_v37 = vcvt.s32.f32 %v368_v10  ;;  %v504_v63 = vunpack.c.0.s8 %v272_v40 }
  0x7b   :  { %v2450_v44 = vcvt.s32.f32 %v372_v13  ;;  %v2452_v50 = vcvt.s32.f32 %v440_v19  ;;  %v2454_v57 = vcvt.s32.f32 %v444_v25  ;;  %v508_v5 = vunpack.c.1.s8 %v272_v40 }
  0x7c   :  { %v296_v25 = vunpack.c.0.s8 %v220_v51  ;;  %v300_v29 = vunpack.c.1.s8 %v220_v51  ;;  %v360_v59 = vunpack.c.0.s8 %v236_v58  ;;  %v2474_v13 = vcvt.s32.f32 %v504_v63 }
  0x7d   :  { %2865 = vst [vmem:[#allocation13_spill] sm:$0xff] %v2452_v50  ;;  %v2476_v53 = vcvt.s32.f32 %v508_v5  ;;  %v432_v19 = vunpack.c.2.s8 %v2464_v36  ;;  %v436_v63 = vunpack.c.3.s8 %v2464_v36 }
  0x7f   :  { %v904_v2 = vpack.c.bf16 %v2476_v53, %v2474_v13 }
  0x96   :  { %v147_v45 = vpop.f32.mrf.mxu0  ;;  %v167_v49 = vpop.f32.mrf.mxu1 }
  0x97   :  { %v148_v33 = vadd.f32 %v147_v45, %v118_v18  ;;  %v168_v6 = vadd.f32 %v167_v49, %v119_v22  ;;  %v364_v22 = vunpack.c.1.s8 %v236_v58  ;;  %v2470_v49 = vld [vmem:[#allocation4 + $0x1b0] sm:$0xff]  ;;  %v2487_v58 = vcvt.s32.f32 %v300_v29 }
  0x98   :  { %v496_v5 = vunpack.c.2.s8 %v2470_v49  ;;  %v288_v29 = vunpack.c.2.s8 %v2479_v47 }
  0x99   :  { %v210_v18 = vmax.f32 %v148_v33, 0.0  ;;  %v211_v45 = vmax.f32 %v168_v6, 0.0  ;;  %v2485_v33 = vcvt.s32.f32 %v296_v25  ;;  %v2489_v6 = vcvt.s32.f32 %v360_v59 }
  0x9a   :  { %v2491_v46 = vcvt.s32.f32 %v364_v22  ;;  %v500_v25 = vunpack.c.3.s8 %v2470_v49  ;;  %v292_v59 = vunpack.c.3.s8 %v2479_v47  ;;  %v2514_v26 = vcvt.s32.f32 %v496_v5 }
  0x9b   :  { %v2481_v40 = vpack.c.bf16 %v210_v18, %v210_v18  ;;  %v2483_v51 = vpack.c.bf16 %v211_v45, %v211_v45  ;;  %v2497_v18 = vcvt.s32.f32 %v432_v19  ;;  %v232_v45 = vld [vmem:[#allocation4 + $0x90] sm:$0xff]  ;;  %v2512_v19 = vcvt.s32.f32 %v436_v63 }
  0x9c   :  { %v2518_v50 = vcvt.s32.f32 %v500_v25  ;;  %v2522_v3 = vcvt.s32.f32 %v292_v59  ;;  %v352_v32 = vunpack.c.2.s8 %v232_v45  ;;  %v800_v38 = vpack.c.bf16 %v2487_v58, %v2485_v33 }
  0x9d   :  { %v187_v10 = vpop.f32.mrf.mxu2  ;;  %v207_v41 = vpop.f32.mrf.mxu3  ;;  %930 = vmatmul.bf16.vlgmr.msrb.gmra.mxu0 %v2481_v40  ;;  %943 = vmatmul.bf16.vlgmr.msrb.gmra.mxu1 %v2483_v51  ;;  %v832_v39 = vpack.c.bf16 %v2491_v46, %v2489_v6  ;;  %v2867_v5 = vpack.c.bf16 %v2384_v4, %v2380_v61  ;;  %v284_v4 = vunpack.c.1.s8 %v2479_v47 }
  0x9e   :  { %v188_v22 = vadd.f32 %v187_v10, %v120_v23  ;;  %v208_v34 = vadd.f32 %v207_v41, %v121_v30  ;;  %1026 = vmatpush.bf16.msrb.mxu0 %v820_v52  ;;  %1039 = vmatpush.bf16.msrb.mxu1 %v852_v56  ;;  %v2520_v23 = vcvt.s32.f32 %v288_v29  ;;  %v356_v52 = vunpack.c.3.s8 %v232_v45  ;;  %v248_v56 = vld [vmem:[#allocation4 + $0x110] sm:$0xff] }
  0x9f   :  { %v424_v41 = vunpack.c.0.s8 %v2464_v36  ;;  %v428_v29 = vunpack.c.1.s8 %v2464_v36  ;;  %v344_v36 = vunpack.c.0.s8 %v232_v45 }
  0xa0   :  { %v212_v30 = vmax.f32 %v188_v22, 0.0  ;;  %v213_v31 = vmax.f32 %v208_v34, 0.0  ;;  %v2866_v34 = vpack.c.bf16 %v2374_v48, %v2372_v43  ;;  %v488_v22 = vunpack.c.0.s8 %v2470_v49  ;;  %v229_v43 = vld [vmem:[#allocation4 + $0x78] sm:$0xff] }
  0xa1   :  { %v2551_v48 = vcvt.s32.f32 %v352_v32  ;;  %v2553_v61 = vcvt.s32.f32 %v356_v52  ;;  %v2562_v59 = vcvt.s32.f32 %v424_v41  ;;  %v2564_v25 = vcvt.s32.f32 %v428_v29 }
  0xa2   :  { %v2531_v10 = vpack.c.bf16 %v212_v30, %v212_v30  ;;  %v2533_v63 = vpack.c.bf16 %v213_v31, %v213_v31  ;;  %1027 = vmatpush.bf16.msrb.mxu0 %v2866_v34  ;;  %1040 = vmatpush.bf16.msrb.mxu1 %v2867_v5  ;;  %v492_v30 = vunpack.c.1.s8 %v2470_v49  ;;  %v280_v31 = vunpack.c.0.s8 %v2479_v47  ;;  %v245_v34 = vld [vmem:[#allocation4 + $0xf8] sm:$0xff] }
  0xa3   :  { %v2868_v5 = vpack.c.bf16 %v2388_v11, %v2386_v8  ;;  %v2869_v49 = vpack.c.bf16 %v2392_v15, %v2390_v12  ;;  %v2566_v32 = vcvt.s32.f32 %v488_v22  ;;  %v348_v52 = vunpack.c.1.s8 %v232_v45 }
  0xa4   :  { %956 = vmatmul.bf16.vlgmr.msrb.gmra.mxu2 %v2531_v10  ;;  %969 = vmatmul.bf16.vlgmr.msrb.gmra.mxu3 %v2533_v63  ;;  %v2870_v47 = vpack.c.bf16 %v2396_v20, %v2394_v16  ;;  %v2871_v8 = vpack.c.bf16 %v2400_v24, %v2398_v21  ;;  %v2574_v11 = vcvt.s32.f32 %v492_v30  ;;  %v2576_v12 = vcvt.s32.f32 %v280_v31 }
  0xa5   :  { %1052 = vmatpush.bf16.msrb.mxu2 %v2868_v5  ;;  %1065 = vmatpush.bf16.msrb.mxu3 %v2869_v49  ;;  %v2578_v15 = vcvt.s32.f32 %v284_v4  ;;  %v337_v41 = vunpack.c.2.s8 %v229_v43  ;;  %v2580_v29 = vcvt.s32.f32 %v344_v36  ;;  %v2582_v22 = vcvt.s32.f32 %v348_v52  ;;  %v264_v49 = vld [vmem:[#allocation4 + $0x190] sm:$0xff] }
  0xa6   :  { %1028 = vmatpush.bf16.msrb.mxu0 %v2870_v47  ;;  %1041 = vmatpush.bf16.msrb.mxu1 %v2871_v8  ;;  %v341_v45 = vunpack.c.3.s8 %v229_v43  ;;  %v401_v5 = vunpack.c.2.s8 %v245_v34  ;;  %v828_v16 = vpack.c.bf16 %v2553_v61, %v2551_v48  ;;  %v405_v21 = vunpack.c.3.s8 %v245_v34 }
  0xa7   :  { %v2586_v20 = vcvt.s32.f32 %v337_v41  ;;  %v416_v24 = vunpack.c.2.s8 %v248_v56  ;;  %v2872_v30 = vpack.c.bf16 %v2406_v28, %v2404_v27  ;;  %v2873_v31 = vpack.c.bf16 %v2414_v42, %v2410_v35  ;;  %v225_v28 = vld [vmem:[#allocation4 + $0x58] sm:$0xff] }
  0xa8   :  { %v864_v4 = vpack.c.bf16 %v2564_v25, %v2562_v59  ;;  %v2596_v36 = vcvt.s32.f32 %v341_v45  ;;  %v2598_v52 = vcvt.s32.f32 %v401_v5  ;;  %v420_v47 = vunpack.c.3.s8 %v248_v56 }
  0xa9   :  { %1053 = vmatpush.bf16.msrb.mxu2 %v2872_v30  ;;  %1066 = vmatpush.bf16.msrb.mxu3 %v2873_v31  ;;  %v2874_v8 = vpack.c.bf16 %v2424_v55, %v2422_v54  ;;  %v2875_v27 = vpack.c.bf16 %v2430_v62, %v2428_v60  ;;  %v2608_v35 = vcvt.s32.f32 %v405_v21  ;;  %v480_v42 = vunpack.c.2.s8 %v264_v49  ;;  %v261_v55 = vld [vmem:[#allocation4 + $0x178] sm:$0xff] }
  0xaa   :  { %v484_v41 = vunpack.c.3.s8 %v264_v49  ;;  %v329_v30 = vunpack.c.0.s8 %v229_v43  ;;  %v333_v54 = vunpack.c.1.s8 %v229_v43  ;;  %v2616_v60 = vcvt.s32.f32 %v416_v24 }
  0xab   :  { %1029 = vmatpush.bf16.msrb.mxu0 %v2874_v8  ;;  %1042 = vmatpush.bf16.msrb.mxu1 %v2875_v27  ;;  %v2618_v62 = vcvt.s32.f32 %v420_v47  ;;  %v393_v31 = vunpack.c.0.s8 %v245_v34  ;;  %v2876_v21 = vpack.c.bf16 %v2434_v1, %v2432_v0  ;;  %v2877_v8 = vpack.c.bf16 %v2438_v9, %v2436_v7  ;;  %v277_v9 = vld [vmem:[#allocation4 + $0x1f8] sm:$0xff] }
  0xac   :  { %v2628_v43 = vcvt.s32.f32 %v480_v42  ;;  %v2630_v5 = vcvt.s32.f32 %v484_v41  ;;  %v397_v24 = vunpack.c.1.s8 %v245_v34  ;;  %v2634_v47 = vcvt.s32.f32 %v329_v30 }
  0xad   :  { %1054 = vmatpush.bf16.msrb.mxu2 %v2876_v21  ;;  %1067 = vmatpush.bf16.msrb.mxu3 %v2877_v8  ;;  %v2636_v0 = vcvt.s32.f32 %v333_v54  ;;  %v408_v1 = vunpack.c.0.s8 %v248_v56  ;;  %v412_v7 = vunpack.c.1.s8 %v248_v56  ;;  %v2878_v21 = vpack.c.bf16 %v2442_v17, %v2440_v14  ;;  %v2880_v14 = vld [vmem:[#allocation13_spill] sm:$0xff] }
  0xae   :  { %982 = vmatmul.bf16.vlgmr.msra.gmra.mxu0 %v2481_v40  ;;  %995 = vmatmul.bf16.vlgmr.msra.gmra.mxu1 %v2483_v51  ;;  %v2879_v42 = vpack.c.bf16 %v2450_v44, %v2448_v37  ;;  %v2644_v34 = vcvt.s32.f32 %v393_v31  ;;  %v2646_v41 = vcvt.s32.f32 %v397_v24  ;;  %v472_v8 = vunpack.c.0.s8 %v264_v49  ;;  %v241_v24 = vld [vmem:[#allocation4 + $0xd8] sm:$0xff] }
  0xaf   :  { %1030 = vmatpush.bf16.msrb.mxu0 %v2878_v21  ;;  %v476_v30 = vunpack.c.1.s8 %v264_v49  ;;  %v2648_v27 = vcvt.s32.f32 %v408_v1  ;;  %v2650_v54 = vcvt.s32.f32 %v412_v7  ;;  %v465_v56 = vunpack.c.2.s8 %v261_v55 }
  0xb0   :  { %1043 = vmatpush.bf16.msrb.mxu1 %v2879_v42  ;;  %v469_v45 = vunpack.c.3.s8 %v261_v55  ;;  %v2881_v17 = vpack.c.bf16 %v2454_v57, %v2880_v14  ;;  %v860_v37 = vpack.c.bf16 %v2618_v62, %v2616_v60  ;;  %v2660_v44 = vcvt.s32.f32 %v472_v8 }
  0xb1   :  { %1068 = vmatpush.bf16.msrb.mxu3 %v904_v2  ;;  %v2662_v49 = vcvt.s32.f32 %v476_v30  ;;  %v529_v31 = vunpack.c.2.s8 %v277_v9  ;;  %v892_v1 = vpack.c.bf16 %v2630_v5, %v2628_v43  ;;  %v2666_v7 = vcvt.s32.f32 %v465_v56 }
  0xb2   :  { %1055 = vmatpush.bf16.msrb.mxu2 %v2881_v17  ;;  %v2668_v57 = vcvt.s32.f32 %v469_v45  ;;  %v533_v21 = vunpack.c.3.s8 %v277_v9  ;;  %v817_v2 = vpack.c.bf16 %v2636_v0, %v2634_v47  ;;  %v849_v53 = vpack.c.bf16 %v2646_v41, %v2644_v34 }
  0xb3   :  { %1031 = vmatpush.bf16.msrb.mxu0 %v800_v38  ;;  %v321_v13 = vunpack.c.2.s8 %v225_v28  ;;  %v325_v5 = vunpack.c.3.s8 %v225_v28  ;;  %v856_v33 = vpack.c.bf16 %v2650_v54, %v2648_v27  ;;  %v888_v58 = vpack.c.bf16 %v2662_v49, %v2660_v44  ;;  %v269_v49 = vld [vmem:[#allocation4 + $0x1b8] sm:$0xff] }
  0xb4   :  { %1044 = vmatpush.bf16.msrb.mxu1 %v832_v39  ;;  %1008 = vmatmul.bf16.vlgmr.msra.gmra.mxu2 %v2531_v10  ;;  %v385_v46 = vunpack.c.2.s8 %v241_v24  ;;  %v389_v6 = vunpack.c.3.s8 %v241_v24  ;;  %v2882_v38 = vpack.c.bf16 %v2512_v19, %v2497_v18  ;;  %v2883_v39 = vpack.c.bf16 %v2518_v50, %v2514_v26 }
  0xb5   :  { %1021 = vmatmul.bf16.vlgmr.msra.gmra.mxu3 %v2533_v63  ;;  %v2692_v45 = vcvt.s32.f32 %v529_v31  ;;  %v2694_v43 = vcvt.s32.f32 %v533_v21  ;;  %v457_v42 = vunpack.c.0.s8 %v261_v55  ;;  %v461_v8 = vunpack.c.1.s8 %v261_v55  ;;  %v257_v31 = vld [vmem:[#allocation4 + $0x158] sm:$0xff] }
  0xb6   :  { %1056 = vmatpush.bf16.msrb.mxu2 %v2882_v38  ;;  %1069 = vmatpush.bf16.msrb.mxu3 %v2883_v39  ;;  %v885_v30 = vpack.c.bf16 %v2668_v57, %v2666_v7  ;;  %v2698_v56 = vcvt.s32.f32 %v321_v13  ;;  %v2700_v14 = vcvt.s32.f32 %v325_v5  ;;  %v521_v17 = vunpack.c.0.s8 %v277_v9 }
  0xb7   :  { %v2884_v18 = vpack.c.bf16 %v2522_v3, %v2520_v23  ;;  %v2708_v26 = vcvt.s32.f32 %v385_v46  ;;  %v2710_v50 = vcvt.s32.f32 %v389_v6  ;;  %v2712_v19 = vcvt.s32.f32 %v457_v42  ;;  %v273_v23 = vld [vmem:[#allocation4 + $0x1d8] sm:$0xff] }
  0xb8   :  { %1045 = vmatpush.bf16.msrb.mxu1 %v828_v16  ;;  %v525_v55 = vunpack.c.1.s8 %v277_v9  ;;  %v2714_v21 = vcvt.s32.f32 %v461_v8  ;;  %v2716_v13 = vcvt.s32.f32 %v521_v17  ;;  %v313_v5 = vunpack.c.0.s8 %v225_v28  ;;  %v221_v42 = vld [vmem:[#allocation4 + $0x38] sm:$0xff] }
  0xb9   :  { %1032 = vmatpush.bf16.msrb.mxu0 %v2884_v18  ;;  %v317_v38 = vunpack.c.1.s8 %v225_v28  ;;  %v2885_v3 = vpack.c.bf16 %v2574_v11, %v2566_v32  ;;  %v917_v48 = vpack.c.bf16 %v2694_v43, %v2692_v45  ;;  %v377_v16 = vunpack.c.0.s8 %v241_v24  ;;  %v2744_v45 = vld [vmem:[#allocation4 + $0xb8] sm:$0xff] }
  0xba   :  { %1057 = vmatpush.bf16.msrb.mxu2 %v864_v4  ;;  %v2726_v61 = vcvt.s32.f32 %v525_v55  ;;  %v381_v9 = vunpack.c.1.s8 %v241_v24  ;;  %v2728_v46 = vcvt.s32.f32 %v313_v5  ;;  %v449_v28 = vunpack.c.2.s8 %v257_v31  ;;  %v217_v5 = vld [vmem:[#allocation4 + $0x18] sm:$0xff] }
  0xbb   :  { %1070 = vmatpush.bf16.msrb.mxu3 %v2885_v3  ;;  %v2730_v6 = vcvt.s32.f32 %v317_v38  ;;  %v453_v39 = vunpack.c.3.s8 %v257_v31  ;;  %v2886_v25 = vpack.c.bf16 %v2578_v15, %v2576_v12  ;;  %v2887_v59 = vpack.c.bf16 %v2582_v22, %v2580_v29 }
  0xbc   :  { %v813_v32 = vpack.c.bf16 %v2700_v14, %v2698_v56  ;;  %v2740_v11 = vcvt.s32.f32 %v377_v16  ;;  %v2742_v4 = vcvt.s32.f32 %v381_v9  ;;  %v513_v24 = vunpack.c.2.s8 %v273_v23 }
  0xbd   :  { %1033 = vmatpush.bf16.msrb.mxu0 %v2886_v25  ;;  %1046 = vmatpush.bf16.msrb.mxu1 %v2887_v59  ;;  %v2888_v43 = vpack.c.bf16 %v2596_v36, %v2586_v20  ;;  %v2889_v12 = vpack.c.bf16 %v2608_v35, %v2598_v52  ;;  %v845_v15 = vpack.c.bf16 %v2710_v50, %v2708_v26  ;;  %v517_v8 = vunpack.c.3.s8 %v273_v23 }
  0xbe   :  { %v881_v29 = vpack.c.bf16 %v2714_v21, %v2712_v19  ;;  %v913_v22 = vpack.c.bf16 %v2726_v61, %v2716_v13  ;;  %1058 = vmatpush.bf16.msrb.mxu2 %v860_v37  ;;  %v809_v20 = vpack.c.bf16 %v2730_v6, %v2728_v46  ;;  %v2763_v36 = vcvt.s32.f32 %v449_v28  ;;  %v233_v61 = vld [vmem:[#allocation4 + $0x98] sm:$0xff] }
  0xbf   :  { %1071 = vmatpush.bf16.msrb.mxu3 %v892_v1  ;;  %v305_v52 = vunpack.c.2.s8 %v221_v42  ;;  %v309_v35 = vunpack.c.3.s8 %v221_v42  ;;  %v841_v56 = vpack.c.bf16 %v2742_v4, %v2740_v11  ;;  %v2769_v14 = vcvt.s32.f32 %v453_v39 }
  0xc0   :  { %1034 = vmatmul.bf16.vlgmr.msrb.gmra.mxu0 %v2481_v40  ;;  %1047 = vmatmul.bf16.vlgmr.msrb.gmra.mxu1 %v2483_v51  ;;  %v369_v60 = vunpack.c.2.s8 %v2744_v45  ;;  %v373_v62 = vunpack.c.3.s8 %v2744_v45  ;;  %v2773_v37 = vcvt.s32.f32 %v513_v24  ;;  %v773_v1 = vcvt.s32.f32 %v517_v8 }
  0xc1   :  { %1078 = vmatpush.bf16.msra.mxu0 %v2888_v43  ;;  %1091 = vmatpush.bf16.msra.mxu1 %v2889_v12  ;;  %v441_v17 = vunpack.c.0.s8 %v257_v31  ;;  %v445_v18 = vunpack.c.1.s8 %v257_v31  ;;  %v2781_v26 = vcvt.s32.f32 %v305_v52  ;;  %v2783_v50 = vcvt.s32.f32 %v309_v35 }
  0xc2   :  { %v2785_v19 = vcvt.s32.f32 %v369_v60  ;;  %v505_v55 = vunpack.c.0.s8 %v273_v23  ;;  %1059 = vmatpush.bf16.msrb.mxu2 %v856_v33  ;;  %v629_v47 = vcvt.s32.f32 %v373_v62  ;;  %v509_v41 = vunpack.c.1.s8 %v273_v23 }
  0xc3   :  { %1072 = vmatpush.bf16.msrb.mxu3 %v888_v58  ;;  %v2793_v0 = vcvt.s32.f32 %v441_v17  ;;  %v2795_v34 = vcvt.s32.f32 %v445_v18  ;;  %v877_v27 = vpack.c.bf16 %v2769_v14, %v2763_v36  ;;  %v301_v44 = vunpack.c.1.s8 %v221_v42 }
  0xc4   :  { %v2802_v54 = vcvt.s32.f32 %v505_v55  ;;  %v909_v33 = vpack.c.bf16 %v773_v1, %v2773_v37  ;;  %v765_v58 = vcvt.s32.f32 %v509_v41  ;;  %v361_v31 = vunpack.c.0.s8 %v2744_v45  ;;  %v265_v1 = vld [vmem:[#allocation4 + $0x198] sm:$0xff] }
  0xc5   :  { %1079 = vmatpush.bf16.msra.mxu0 %v817_v2  ;;  %1092 = vmatpush.bf16.msra.mxu1 %v849_v53  ;;  %v253_v2 = vld [vmem:[#allocation4 + $0x138] sm:$0xff]  ;;  %v297_v53 = vunpack.c.0.s8 %v221_v42  ;;  %v365_v21 = vunpack.c.1.s8 %v2744_v45  ;;  %v2809_v57 = vcvt.s32.f32 %v301_v44  ;;  %v805_v38 = vpack.c.bf16 %v2783_v50, %v2781_v26 }
  0xc6   :  { %1104 = vmatpush.bf16.msra.mxu2 %v885_v30  ;;  %v433_v30 = vunpack.c.2.s8 %v253_v2  ;;  %v437_v13 = vunpack.c.3.s8 %v253_v2  ;;  %1073 = vmatmul.bf16.vlgmr.msrb.gmra.mxu3 %v2533_v63  ;;  %v837_v23 = vpack.c.bf16 %v629_v47, %v2785_v19  ;;  %v873_v3 = vpack.c.bf16 %v2795_v34, %v2793_v0 }
  0xc7   :  { %1117 = vmatpush.bf16.msra.mxu3 %v917_v48  ;;  %v2807_v7 = vcvt.s32.f32 %v297_v53  ;;  %1060 = vmatmul.bf16.vlgmr.msrb.gmra.mxu2 %v2531_v10  ;;  %v497_v48 = vunpack.c.2.s8 %v269_v49  ;;  %v905_v16 = vpack.c.bf16 %v765_v58, %v2802_v54  ;;  %v617_v9 = vcvt.s32.f32 %v361_v31 }
  0xc8   :  { %v621_v46 = vcvt.s32.f32 %v365_v21  ;;  %v501_v6 = vunpack.c.3.s8 %v269_v49  ;;  %v689_v39 = vcvt.s32.f32 %v433_v30  ;;  %v289_v42 = vunpack.c.2.s8 %v217_v5 }
  0xc9   :  { %1080 = vmatpush.bf16.msra.mxu0 %v813_v32  ;;  %1093 = vmatpush.bf16.msra.mxu1 %v845_v15  ;;  %v801_v28 = vpack.c.bf16 %v2809_v57, %v2807_v7  ;;  %v293_v25 = vunpack.c.3.s8 %v217_v5  ;;  %v693_v59 = vcvt.s32.f32 %v437_v13  ;;  %v753_v32 = vcvt.s32.f32 %v497_v48  ;;  %v2070_v48 = vld [vmem:[#allocation7 + $0x38] sm:$0xff] }
  0xca   :  { %1105 = vmatpush.bf16.msra.mxu2 %v881_v29  ;;  %v353_v11 = vunpack.c.2.s8 %v233_v61  ;;  %v357_v4 = vunpack.c.3.s8 %v233_v61  ;;  %v757_v24 = vcvt.s32.f32 %v501_v6  ;;  %v545_v45 = vcvt.s32.f32 %v289_v42 }
  0xcb   :  { %1118 = vmatpush.bf16.msra.mxu3 %v913_v22  ;;  %v425_v43 = vunpack.c.0.s8 %v253_v2  ;;  %v429_v12 = vunpack.c.1.s8 %v253_v2  ;;  %v549_v15 = vcvt.s32.f32 %v293_v25  ;;  %v489_v8 = vunpack.c.0.s8 %v269_v49  ;;  %v2068_v25 = vld [vmem:[#allocation7 + $0x28] sm:$0xff] }
  0xcc   :  { %v609_v29 = vcvt.s32.f32 %v353_v11  ;;  %v613_v22 = vcvt.s32.f32 %v357_v4  ;;  %v833_v36 = vpack.c.bf16 %v621_v46, %v617_v9  ;;  %v493_v14 = vunpack.c.1.s8 %v269_v49  ;;  %v2065_v11 = vld [vmem:[#allocation7 + $0x10] sm:$0xff] }
  0xcd   :  { %1081 = vmatpush.bf16.msra.mxu0 %v809_v20  ;;  %1094 = vmatpush.bf16.msra.mxu1 %v841_v56  ;;  %v681_v52 = vcvt.s32.f32 %v425_v43  ;;  %v685_v35 = vcvt.s32.f32 %v429_v12  ;;  %v249_v20 = vld [vmem:[#allocation4 + $0x118] sm:$0xff]  ;;  %v869_v56 = vpack.c.bf16 %v693_v59, %v689_v39  ;;  %v745_v60 = vcvt.s32.f32 %v489_v8  ;;  %v2067_v59 = vld [vmem:[#allocation7 + $0x20] sm:$0xff]  ;;  %v2072_v8 = vld [vmem:[#allocation7 + $0x48] sm:$0xff] }
  0xce   :  { %1106 = vmatpush.bf16.msra.mxu2 %v877_v27  ;;  %v281_v62 = vunpack.c.0.s8 %v217_v5  ;;  %v285_v37 = vunpack.c.1.s8 %v217_v5  ;;  %v901_v17 = vpack.c.bf16 %v757_v24, %v753_v32  ;;  %v749_v18 = vcvt.s32.f32 %v493_v14  ;;  %v2066_v32 = vld [vmem:[#allocation7 + $0x18] sm:$0xff]  ;;  %v2077_v4 = vld [vmem:[#allocation7 + $0x70] sm:$0xff]  ;;  %v2076_v24 = vld [vmem:[#allocation7 + $0x68] sm:$0xff] }
  0xcf   :  { %1119 = vmatpush.bf16.msra.mxu3 %v909_v33  ;;  %v345_v26 = vunpack.c.0.s8 %v233_v61  ;;  %v349_v50 = vunpack.c.1.s8 %v233_v61  ;;  %v797_v19 = vpack.c.bf16 %v549_v15, %v545_v45  ;;  %v829_v55 = vpack.c.bf16 %v613_v22, %v609_v29  ;;  %v2078_v61 = vld [vmem:[#allocation7 + $0x78] sm:$0xff]  ;;  %v2075_v45 = vld [vmem:[#allocation7 + $0x60] sm:$0xff]  ;;  %v2101_v12 = vld [vmem:[#allocation9 + $0x30] sm:$0xff] }
  0xd0   :  { %v417_v47 = vunpack.c.2.s8 %v249_v20  ;;  %v421_v0 = vunpack.c.3.s8 %v249_v20  ;;  %v865_v34 = vpack.c.bf16 %v685_v35, %v681_v52  ;;  %v537_v41 = vcvt.s32.f32 %v281_v62  ;;  %v2102_v43 = vld [vmem:[#allocation9 + $0x38] sm:$0xff]  ;;  %v2073_v15 = vld [vmem:[#allocation7 + $0x50] sm:$0xff]  ;;  %v2100_v22 = vld [vmem:[#allocation9 + $0x28] sm:$0xff] }
  0xd1   :  { %1082 = vmatpush.bf16.msra.mxu0 %v805_v38  ;;  %1095 = vmatpush.bf16.msra.mxu1 %v837_v23  ;;  %v541_v2 = vcvt.s32.f32 %v285_v37  ;;  %v481_v27 = vunpack.c.2.s8 %v265_v1  ;;  %v897_v54 = vpack.c.bf16 %v749_v18, %v745_v60  ;;  %v601_v53 = vcvt.s32.f32 %v345_v26  ;;  %v2085_v29 = vld [vmem:[#allocation7 + $0xb0] sm:$0xff]  ;;  %v2099_v52 = vld [vmem:[#allocation9 + $0x20] sm:$0xff]  ;;  %v2082_v60 = vld [vmem:[#allocation7 + $0x98] sm:$0xff] }
  0xd2   :  { %1107 = vmatpush.bf16.msra.mxu2 %v873_v3  ;;  %v605_v44 = vcvt.s32.f32 %v349_v50  ;;  %v485_v49 = vunpack.c.3.s8 %v265_v1  ;;  %v673_v33 = vcvt.s32.f32 %v417_v47  ;;  %v677_v58 = vcvt.s32.f32 %v421_v0  ;;  %v2071_v35 = vld [vmem:[#allocation7 + $0x40] sm:$0xff]  ;;  %v2097_v62 = vld [vmem:[#allocation9 + $0x10] sm:$0xff]  ;;  %v2096_v26 = vld [vmem:[#allocation9 + $0x8] sm:$0xff] }
  0xd3   :  { %1120 = vmatpush.bf16.msra.mxu3 %v905_v16  ;;  %v737_v31 = vcvt.s32.f32 %v481_v27  ;;  %v409_v21 = vunpack.c.0.s8 %v249_v20  ;;  %v413_v57 = vunpack.c.1.s8 %v249_v20  ;;  %v473_v30 = vunpack.c.0.s8 %v265_v1  ;;  %v2083_v14 = vld [vmem:[#allocation7 + $0xa0] sm:$0xff]  ;;  %v2098_v20 = vld [vmem:[#allocation9 + $0x18] sm:$0xff]  ;;  %v2109_v37 = vld [vmem:[#allocation9 + $0x70] sm:$0xff] }
  0xd4   :  { %v741_v7 = vcvt.s32.f32 %v485_v49  ;;  %v477_v13 = vunpack.c.1.s8 %v265_v1  ;;  %v793_v5 = vpack.c.bf16 %v541_v2, %v537_v41  ;;  %v825_v38 = vpack.c.bf16 %v605_v44, %v601_v53  ;;  %v2081_v18 = vld [vmem:[#allocation7 + $0x90] sm:$0xff]  ;;  %v2108_v50 = vld [vmem:[#allocation9 + $0x68] sm:$0xff]  ;;  %v2107_v47 = vld [vmem:[#allocation9 + $0x60] sm:$0xff] }
  0xd5   :  { %1083 = vmatpush.bf16.msra.mxu0 %v801_v28  ;;  %1096 = vmatpush.bf16.msra.mxu1 %v833_v36  ;;  %v861_v23 = vpack.c.bf16 %v677_v58, %v673_v33  ;;  %v665_v3 = vcvt.s32.f32 %v409_v21  ;;  %v669_v9 = vcvt.s32.f32 %v413_v57  ;;  %v729_v46 = vcvt.s32.f32 %v473_v30  ;;  %v2069_v28 = vld [vmem:[#allocation7 + $0x30] sm:$0xff]  ;;  %v2084_v36 = vld [vmem:[#allocation7 + $0xa8] sm:$0xff]  ;;  %v2079_v41 = vld [vmem:[#allocation7 + $0x80] sm:$0xff] }
  0xd6   :  { %1108 = vmatpush.bf16.msra.mxu2 %v869_v56  ;;  %v893_v16 = vpack.c.bf16 %v741_v7, %v737_v31  ;;  %v733_v6 = vcvt.s32.f32 %v477_v13  ;;  %v2110_v56 = vld [vmem:[#allocation9 + $0x78] sm:$0xff]  ;;  %v2093_v31 = vld [vmem:[#allocation7 + $0xf0] sm:$0xff] }
  0xd7   :  { %1121 = vmatpush.bf16.msra.mxu3 %v901_v17  ;;  %v857_v39 = vpack.c.bf16 %v669_v9, %v665_v3  ;;  %v2094_v2 = vld [vmem:[#allocation7 + $0xf8] sm:$0xff]  ;;  %v2105_v57 = vld [vmem:[#allocation9 + $0x50] sm:$0xff]  ;;  %v2092_v3 = vld [vmem:[#allocation7 + $0xe8] sm:$0xff] }
  0xd8   :  { %v889_v42 = vpack.c.bf16 %v733_v6, %v729_v46  ;;  %v2118_v53 = vld [vmem:[#allocation9 + $0xb8] sm:$0xff]  ;;  %v2117_v30 = vld [vmem:[#allocation9 + $0xb0] sm:$0xff] }
  0xd9   :  { %1084 = vmatpush.bf16.msra.mxu0 %v797_v19  ;;  %1097 = vmatpush.bf16.msra.mxu1 %v829_v55  ;;  %v2080_v19 = vld [vmem:[#allocation7 + $0x88] sm:$0xff]  ;;  %v2095_v55 = vld [vmem:[#allocation9] sm:$0xff]  ;;  %v2828_v44 = vld [vmem:[%s2856_s4] sm:$0xf] }
  0xda   :  { %1109 = vmatpush.bf16.msra.mxu2 %v865_v34  ;;  %v2830_v58 = vld [vmem:[#allocation6] sm:$0xf]  ;;  %v1132_v7 = vperm.slane %v2828_v44, 0 }
  0xdb   :  { %1122 = vmatpush.bf16.msra.mxu3 %v897_v54  ;;  %v2106_v54 = vld [vmem:[#allocation9 + $0x58] sm:$0xff] }
  0xdd   :  { %1085 = vmatpush.bf16.msra.mxu0 %v793_v5  ;;  %1098 = vmatpush.bf16.msra.mxu1 %v825_v38  ;;  %v1146_v5 = vperm.slane %v2830_v58, 0 }
  0xde   :  { %1110 = vmatpush.bf16.msra.mxu2 %v861_v23 }
  0xdf   :  { %1123 = vmatpush.bf16.msra.mxu3 %v893_v16  ;;  %v2116_v16 = vld [vmem:[#allocation9 + $0xa8] sm:$0xff] }
  0xe0   :  { %1086 = vmatmul.bf16.vlgmr.msra.gmra.mxu0 %v2481_v40  ;;  %1099 = vmatmul.bf16.vlgmr.msra.gmra.mxu1 %v2483_v51  ;;  %v2064_v40 = vld [vmem:[#allocation7 + $0x8] sm:$0xff]  ;;  %v2063_v51 = vld [vmem:[#allocation7] sm:$0xff] }
  0xe1   :  { %1426 = vmatpush.bf16.msrb.mxu0 %v2070_v48  ;;  %1439 = vmatpush.bf16.msrb.mxu1 %v2078_v61  ;;  %v2104_v61 = vld [vmem:[#allocation9 + $0x48] sm:$0xff] }
  0xe2   :  { %1111 = vmatpush.bf16.msra.mxu2 %v857_v39 }
  0xe3   :  { %1124 = vmatpush.bf16.msra.mxu3 %v889_v42  ;;  %v2103_v42 = vld [vmem:[#allocation9 + $0x40] sm:$0xff] }
  0xe5   :  { %1427 = vmatpush.bf16.msrb.mxu0 %v2069_v28  ;;  %1112 = vmatmul.bf16.vlgmr.msra.gmra.mxu2 %v2531_v10  ;;  %v2074_v10 = vld [vmem:[#allocation7 + $0x58] sm:$0xff]  ;;  %v2091_v28 = vld [vmem:[#allocation7 + $0xe0] sm:$0xff] }
  0xe6   :  { %1125 = vmatmul.bf16.vlgmr.msra.gmra.mxu3 %v2533_v63  ;;  %1440 = vmatpush.bf16.msrb.mxu1 %v2077_v4  ;;  %v2086_v63 = vld [vmem:[#allocation7 + $0xb8] sm:$0xff] }
  0xe7   :  { %1452 = vmatpush.bf16.msrb.mxu2 %v2086_v63  ;;  %1465 = vmatpush.bf16.msrb.mxu3 %v2094_v2  ;;  %v2090_v4 = vld [vmem:[#allocation7 + $0xd8] sm:$0xff]  ;;  %v1133_v63 = vperm.slane %v2828_v44, 1 }
  0xe9   :  { %1428 = vmatpush.bf16.msrb.mxu0 %v2068_v25  ;;  %v2115_v25 = vld [vmem:[#allocation9 + $0xa0] sm:$0xff] }
  0xea   :  { %1441 = vmatpush.bf16.msrb.mxu1 %v2076_v24 }
  0xeb   :  { %1453 = vmatpush.bf16.msrb.mxu2 %v2085_v29  ;;  %1466 = vmatpush.bf16.msrb.mxu3 %v2093_v31 }
  0xed   :  { %1429 = vmatpush.bf16.msrb.mxu0 %v2067_v59 }
  0xee   :  { %1442 = vmatpush.bf16.msrb.mxu1 %v2075_v45 }
  0xef   :  { %1454 = vmatpush.bf16.msrb.mxu2 %v2084_v36  ;;  %1467 = vmatpush.bf16.msrb.mxu3 %v2092_v3 }
  0xf1   :  { %1430 = vmatpush.bf16.msrb.mxu0 %v2066_v32 }
  0xf2   :  { %1443 = vmatpush.bf16.msrb.mxu1 %v2074_v10 }
  0xf3   :  { %1455 = vmatpush.bf16.msrb.mxu2 %v2083_v14  ;;  %1468 = vmatpush.bf16.msrb.mxu3 %v2091_v28 }
  0xf5   :  { %1431 = vmatpush.bf16.msrb.mxu0 %v2065_v11 }
  0xf6   :  { %1444 = vmatpush.bf16.msrb.mxu1 %v2073_v15  ;;  %v2088_v15 = vld [vmem:[#allocation7 + $0xc8] sm:$0xff] }
  0xf7   :  { %1456 = vmatpush.bf16.msrb.mxu2 %v2082_v60  ;;  %1469 = vmatpush.bf16.msrb.mxu3 %v2090_v4  ;;  %v2087_v60 = vld [vmem:[#allocation7 + $0xc0] sm:$0xff] }
  0xf9   :  { %1432 = vmatpush.bf16.msrb.mxu0 %v2064_v40  ;;  %v2114_v40 = vld [vmem:[#allocation9 + $0x98] sm:$0xff] }
  0xfa   :  { %1445 = vmatpush.bf16.msrb.mxu1 %v2072_v8  ;;  %v2112_v8 = vld [vmem:[#allocation9 + $0x88] sm:$0xff] }
  0xfb   :  { %1457 = vmatpush.bf16.msrb.mxu2 %v2081_v18 }
  0xfd   :  { %1433 = vmatpush.bf16.msrb.mxu0 %v2063_v51 }
  0xfe   :  { %1446 = vmatpush.bf16.msrb.mxu1 %v2071_v35 }
  0xff   :  { %1458 = vmatpush.bf16.msrb.mxu2 %v2080_v19 }
 0x101   :  { %1739 = vmatpush.bf16.msra.mxu0 %v2102_v43  ;;  %v2089_v43 = vld [vmem:[#allocation7 + $0xd0] sm:$0xff] }
 0x102   :  { %1752 = vmatpush.bf16.msra.mxu1 %v2110_v56  ;;  %1470 = vmatpush.bf16.msrb.mxu3 %v2089_v43 }
 0x103   :  { %1459 = vmatpush.bf16.msrb.mxu2 %v2079_v41  ;;  %v1134_v41 = vperm.slane %v2828_v44, 2 }
 0x105   :  { %1740 = vmatpush.bf16.msra.mxu0 %v2101_v12  ;;  %v2113_v12 = vld [vmem:[#allocation9 + $0x90] sm:$0xff] }
 0x106   :  { %1753 = vmatpush.bf16.msra.mxu1 %v2109_v37  ;;  %1471 = vmatpush.bf16.msrb.mxu3 %v2088_v15  ;;  %v2111_v37 = vld [vmem:[#allocation9 + $0x80] sm:$0xff] }
 0x107   :  { %1765 = vmatpush.bf16.msra.mxu2 %v2118_v53 }
 0x109   :  { %1741 = vmatpush.bf16.msra.mxu0 %v2100_v22  ;;  %v1147_v22 = vperm.slane %v2830_v58, 1 }
 0x10a   :  { %1754 = vmatpush.bf16.msra.mxu1 %v2108_v50  ;;  %1472 = vmatpush.bf16.msrb.mxu3 %v2087_v60  ;;  %v2125_v50 = vld [vmem:[#allocation9 + $0xf0] sm:$0xff] }
 0x10b   :  { %1766 = vmatpush.bf16.msra.mxu2 %v2117_v30 }
 0x10d   :  { %1742 = vmatpush.bf16.msra.mxu0 %v2099_v52 }
 0x10e   :  { %1755 = vmatpush.bf16.msra.mxu1 %v2107_v47 }
 0x10f   :  { %1767 = vmatpush.bf16.msra.mxu2 %v2116_v16 }
 0x111   :  { %1743 = vmatpush.bf16.msra.mxu0 %v2098_v20 }
 0x112   :  { %1756 = vmatpush.bf16.msra.mxu1 %v2106_v54  ;;  %v2123_v54 = vld [vmem:[#allocation9 + $0xe0] sm:$0xff] }
 0x113   :  { %1768 = vmatpush.bf16.msra.mxu2 %v2115_v25 }
 0x115   :  { %1744 = vmatpush.bf16.msra.mxu0 %v2097_v62 }
 0x116   :  { %1757 = vmatpush.bf16.msra.mxu1 %v2105_v57  ;;  %v2121_v57 = vld [vmem:[#allocation9 + $0xd0] sm:$0xff] }
 0x117   :  { %1769 = vmatpush.bf16.msra.mxu2 %v2114_v40 }
 0x119   :  { %1745 = vmatpush.bf16.msra.mxu0 %v2096_v26 }
 0x11a   :  { %v931_v1 = vpop.f32.mrf.mxu0  ;;  %v944_v17 = vpop.f32.mrf.mxu1  ;;  %1758 = vmatpush.bf16.msra.mxu1 %v2104_v61 }
 0x11b   :  { %v945_v27 = vadd.f32 %v944_v17, %v931_v1  ;;  %1770 = vmatpush.bf16.msra.mxu2 %v2113_v12  ;;  %v2126_v1 = vld [vmem:[#allocation9 + $0xf8] sm:$0xff] }
 0x11c   :  { %1778 = vmatpush.bf16.msra.mxu3 %v2126_v1 }
 0x11d   :  { %1746 = vmatpush.bf16.msra.mxu0 %v2095_v55 }
 0x11e   :  { %1759 = vmatpush.bf16.msra.mxu1 %v2103_v42 }
 0x11f   :  { %1771 = vmatpush.bf16.msra.mxu2 %v2112_v8 }
 0x120   :  { %1779 = vmatpush.bf16.msra.mxu3 %v2125_v50 }
 0x122   :  { %v933_v0 = vpop.f32.mrf.mxu0  ;;  %v946_v34 = vpop.f32.mrf.mxu1 }
 0x123   :  { %1772 = vmatpush.bf16.msra.mxu2 %v2111_v37  ;;  %v2124_v0 = vld [vmem:[#allocation9 + $0xe8] sm:$0xff] }
 0x124   :  { %1780 = vmatpush.bf16.msra.mxu3 %v2124_v0 }
 0x127   :  { %v957_v49 = vpop.f32.mrf.mxu2  ;;  %v970_v33 = vpop.f32.mrf.mxu3 }
 0x128   :  { %v958_v21 = vadd.f32 %v957_v49, %v945_v27  ;;  %v1148_v27 = vperm.slane %v2830_v58, 2  ;;  %1781 = vmatpush.bf16.msra.mxu3 %v2123_v54 }
 0x12a   :  { %v971_v13 = vadd.f32 %v970_v33, %v958_v21  ;;  %v2122_v21 = vld [vmem:[#allocation9 + $0xd8] sm:$0xff] }
 0x12b   :  { %v983_v38 = vpop.f32.mrf.mxu0  ;;  %v996_v23 = vpop.f32.mrf.mxu1 }
 0x12c   :  { %v1140_v48 = vmul.f32 %v1132_v7, %v971_v13  ;;  %v997_v24 = vadd.f32 %v996_v23, %v983_v38  ;;  %1782 = vmatpush.bf16.msra.mxu3 %v2122_v21  ;;  %v2120_v13 = vld [vmem:[#allocation9 + $0xc8] sm:$0xff]  ;;  %v2119_v23 = vld [vmem:[#allocation9 + $0xc0] sm:$0xff] }
 0x12e   :  { %v1154_v9 = vadd.f32 %v1146_v5, %v1140_v48 }
 0x12f   :  { %v959_v46 = vpop.f32.mrf.mxu2  ;;  %v972_v6 = vpop.f32.mrf.mxu3 }
 0x130   :  { %v1158_v39 = vmax.f32 %v1154_v9, 0.0  ;;  %1783 = vmatpush.bf16.msra.mxu3 %v2121_v57  ;;  %v1135_v6 = vperm.slane %v2828_v44, 3 }
 0x132   :  { %v1162_v59 = vpack.c.bf16 %v1158_v39, %v1158_v39  ;;  %v1149_v39 = vperm.slane %v2830_v58, 3  ;;  %v2136_v58 = vld [vmem:[%s2859_s7] ss:$0 sm:$0xff] }
 0x133   :  { %v985_v32 = vpop.f32.mrf.mxu0  ;;  %v998_v11 = vpop.f32.mrf.mxu1 }
 0x134   :  { %1434 = vmatmul.bf16.vlgmr.msrb.gmra.mxu0 %v1162_v59  ;;  %1784 = vmatpush.bf16.msra.mxu3 %v2120_v13 }
 0x137   :  { %v1009_v51 = vpop.f32.mrf.mxu2 }
 0x138   :  { %v1022_v45 = vpop.f32.mrf.mxu3  ;;  %v1010_v10 = vadd.f32 %v1009_v51, %v997_v24  ;;  %1785 = vmatpush.bf16.msra.mxu3 %v2119_v23 }
 0x13a   :  { %v1023_v29 = vadd.f32 %v1022_v45, %v1010_v10 }
 0x13c   :  { %v1141_v35 = vmul.f32 %v1133_v63, %v1023_v29 }
 0x13d   :  { %v1035_v36 = vpop.f32.mrf.mxu0  ;;  %v1048_v52 = vpop.f32.mrf.mxu1 }
 0x13e   :  { %v1155_v14 = vadd.f32 %v1147_v22, %v1141_v35  ;;  %v1049_v19 = vadd.f32 %v1048_v52, %v1035_v36 }
 0x13f   :  { %v1011_v20 = vpop.f32.mrf.mxu2 }
 0x140   :  { %v1024_v56 = vpop.f32.mrf.mxu3  ;;  %v1159_v62 = vmax.f32 %v1155_v14, 0.0  ;;  %v2137_v20 = vld [vmem:[%s2861_s9] ss:$0 sm:$0xff] }
 0x142   :  { %v1163_v17 = vpack.c.bf16 %v1159_v62, %v1159_v62 }
 0x144   :  { %1447 = vmatmul.bf16.vlgmr.msrb.gmra.mxu1 %v1163_v17  ;;  %1747 = vmatmul.bf16.vlgmr.msra.gmra.mxu0 %v1162_v59 }
 0x145   :  { %v1037_v18 = vpop.f32.mrf.mxu0  ;;  %v1050_v26 = vpop.f32.mrf.mxu1 }
 0x149   :  { %v1074_v47 = vpop.f32.mrf.mxu3 }
 0x14a   :  { %v1061_v55 = vpop.f32.mrf.mxu2 }
 0x14b   :  { %v1062_v34 = vadd.f32 %v1061_v55, %v1049_v19 }
 0x14d   :  { %v1075_v2 = vadd.f32 %v1074_v47, %v1062_v34 }
 0x14f   :  { %v1142_v53 = vmul.f32 %v1134_v41, %v1075_v2 }
 0x151   :  { %v1156_v49 = vadd.f32 %v1148_v27, %v1142_v53  ;;  %v1076_v31 = vpop.f32.mrf.mxu3 }
 0x152   :  { %v1063_v33 = vpop.f32.mrf.mxu2 }
 0x153   :  { %v1160_v7 = vmax.f32 %v1156_v49, 0.0 }
 0x154   :  { %1760 = vmatmul.bf16.vlgmr.msra.gmra.mxu1 %v1163_v17 }
 0x155   :  { %v1164_v30 = vpack.c.bf16 %v1160_v7, %v1160_v7 }
 0x157   :  { %1460 = vmatmul.bf16.vlgmr.msrb.gmra.mxu2 %v1164_v30 }
 0x15d   :  { %v1087_v5 = vpop.f32.mrf.mxu0  ;;  %v1100_v38 = vpop.f32.mrf.mxu1 }
 0x15e   :  { %v1101_v61 = vadd.f32 %v1100_v38, %v1087_v5 }
 0x165   :  { %v1089_v3 = vpop.f32.mrf.mxu0  ;;  %v1102_v48 = vpop.f32.mrf.mxu1 }
 0x167   :  { %1773 = vmatmul.bf16.vlgmr.msra.gmra.mxu2 %v1164_v30 }
 0x168   :  { %v1113_v16 = vpop.f32.mrf.mxu2 }
 0x169   :  { %v1126_v9 = vpop.f32.mrf.mxu3  ;;  %v1114_v46 = vadd.f32 %v1113_v16, %v1101_v61 }
 0x16b   :  { %v1127_v28 = vadd.f32 %v1126_v9, %v1114_v46 }
 0x16d   :  { %v1143_v42 = vmul.f32 %v1135_v6, %v1127_v28 }
 0x16f   :  { %v1157_v25 = vadd.f32 %v1149_v39, %v1143_v42 }
 0x170   :  { %v1115_v59 = vpop.f32.mrf.mxu2 }
 0x171   :  { %v1128_v32 = vpop.f32.mrf.mxu3  ;;  %v1161_v11 = vmax.f32 %v1157_v25, 0.0 }
 0x173   :  { %v1165_v4 = vpack.c.bf16 %v1161_v11, %v1161_v11 }
 0x175   :  { %1473 = vmatmul.bf16.vlgmr.msrb.gmra.mxu3 %v1165_v4 }
 0x185   :  { %1786 = vmatmul.bf16.vlgmr.msra.gmra.mxu3 %v1165_v4 }
 0x1b1   :  { %v1435_v40 = vpop.f32.mrf.mxu0 }
 0x1b2   :  { %v1436_v22 = vadd.f32 %v2136_v58, %v1435_v40 }
 0x1b9   :  { %v1437_v24 = vpop.f32.mrf.mxu0 }
 0x1c1   :  { %v1448_v51 = vpop.f32.mrf.mxu1  ;;  %v1748_v45 = vpop.f32.mrf.mxu0 }
 0x1c2   :  { %v1449_v36 = vadd.f32 %v1448_v51, %v1436_v22  ;;  %v1749_v60 = vadd.f32 %v2137_v20, %v1748_v45 }
 0x1c9   :  { %v1450_v43 = vpop.f32.mrf.mxu1  ;;  %v1750_v10 = vpop.f32.mrf.mxu0 }
 0x1d1   :  { %v1761_v63 = vpop.f32.mrf.mxu1 }
 0x1d2   :  { %v1762_v62 = vadd.f32 %v1761_v63, %v1749_v60 }
 0x1d9   :  { %v1763_v12 = vpop.f32.mrf.mxu1 }
 0x1da   :  { %v1461_v44 = vpop.f32.mrf.mxu2 }
 0x1db   :  { %v1462_v52 = vadd.f32 %v1461_v44, %v1449_v36 }
 0x1e2   :  { %v1463_v15 = vpop.f32.mrf.mxu2 }
 0x1ea   :  { %v1774_v29 = vpop.f32.mrf.mxu2 }
 0x1eb   :  { %v1775_v37 = vadd.f32 %v1774_v29, %v1762_v62 }
 0x1f2   :  { %v1776_v8 = vpop.f32.mrf.mxu2 }
 0x1f8   :  { %v1474_v35 = vpop.f32.mrf.mxu3 }
 0x1f9   :  { %v1475_v14 = vadd.f32 %v1474_v35, %v1462_v52 }
 0x1fb   :  { %1478 = vst [vmem:[%s2862_s10] sm:$0xff] %v1475_v14 }
 0x200   :  { %v1476_v56 = vpop.f32.mrf.mxu3 }
 0x208   :  { %v1787_v1 = vpop.f32.mrf.mxu3 }
 0x209   :  { %v1788_v17 = vadd.f32 %v1787_v1, %v1775_v37 }
 0x20b   :  { %1791 = vst [vmem:[%s2863_s11] sm:$0xff] %v1788_v17 }
 0x210   :  { %v1789_v18 = vpop.f32.mrf.mxu3 }
 0x211   :  { %1800 = vsyncpa [#allocation3], 1 }
 0x212   :  { %1801 = vsyncpa [#allocation5], 1 }
 0x213   :  { %1802 = vsyncpa [#allocation8], 1 }

</bundles_post_ra>
